<compile_context>
chip_gen: v7x
topology: tpu7x:2x2x1
jax: 0.10.0
libtpu: 0.0.40
codegen_flags: <defaults>
</compile_context>

<pallas_src>
import functools

import jax
import jax.numpy as jnp
from jax.experimental import pallas as pl
from jax.experimental.pallas import tpu as pltpu


def _round_up(n, m):
    return ((n + m - 1) // m) * m


def _elu(h):
    # ELU(alpha=1): h if h > 0 else exp(h) - 1  (clamp exp arg for safety)
    return jnp.where(h > 0, h, jnp.exp(jnp.minimum(h, 0.0)) - 1.0)


def _sigmoid(h):
    # numerically stable: single exp of a non-positive argument
    e = jnp.exp(-jnp.abs(h))
    return jnp.where(h >= 0, 1.0 / (1.0 + e), e / (1.0 + e))


def cvae_kernel(
    xc_ref, cdec_ref, eps_ref,
    w1_ref, b1_ref,
    w21_ref, b21_ref,
    w22_ref, b22_ref,
    w3_ref, b3_ref,
    w4_ref, b4_ref,
    recon_ref, mu_ref, logvar_ref,
    *, dot_dtype,
):
    f32 = jnp.float32

    # ---- encode: fc1(cat([x, c])) is ONE fused matmul (input pre-concatenated) ----
    xc = xc_ref[...].astype(dot_dtype)
    h1 = jnp.dot(xc, w1_ref[...], preferred_element_type=f32) + b1_ref[...]
    h1 = _elu(h1).astype(dot_dtype)

    mu = jnp.dot(h1, w21_ref[...], preferred_element_type=f32) + b21_ref[...]
    logvar = jnp.dot(h1, w22_ref[...], preferred_element_type=f32) + b22_ref[...]

    # ---- reparameterize: z = mu + eps * exp(0.5 * logvar)  (f32 elementwise) ----
    z = mu + eps_ref[...] * jnp.exp(0.5 * logvar)

    # ---- decode: fc3(cat([z, c])) fused: padded z cols are 0, c lives in cols [L, L+C)
    zc = (z + cdec_ref[...]).astype(dot_dtype)
    h3 = jnp.dot(zc, w3_ref[...], preferred_element_type=f32) + b3_ref[...]
    h3 = _elu(h3).astype(dot_dtype)

    recon = _sigmoid(jnp.dot(h3, w4_ref[...], preferred_element_type=f32) + b4_ref[...])

    recon_ref[...] = recon
    mu_ref[...] = mu
    logvar_ref[...] = logvar


def cvae_forward(x, c, eps, params, *, dot_dtype=jnp.float32, max_batch_tile=256):
    """x: (B, S) with S = seq_length*4, c: (B, class_size), eps: (B, latent_size)."""
    f32 = jnp.float32
    B, S = x.shape
    C = c.shape[1]
    L = eps.shape[1]
    H = params["w1x"].shape[1]

    # Lane/sublane-friendly padded sizes (f32 vreg tile = (8, 128)).
    Sp = _round_up(S, 128)            # decoder output width
    SCp = _round_up(S + C, 128)       # fused encoder input width
    Lp = _round_up(L + C, 128)        # latent width; also hosts the decoder's c slot
    Hp = _round_up(H, 128)            # hidden 400 -> 512

    Bp = _round_up(B, 8)
    TB = min(max_batch_tile, Bp)      # batch tile (NOTE: re-derive for v7x 64MiB VMEM if huge)
    Bp = _round_up(Bp, TB)
    grid = (Bp // TB,)

    # ---- padded, fused activations -----------------------------------------
    xc = jnp.zeros((Bp, SCp), f32).at[:B, :S].set(x).at[:B, S:S + C].set(c)
    # decoder concat: c sits in latent columns [L, L+C); padded z columns are 0.
    cdec = jnp.zeros((Bp, Lp), f32).at[:B, L:L + C].set(c)
    # eps MUST be zero in columns >= L so padded z stays exactly 0 there.
    epsp = jnp.zeros((Bp, Lp), f32).at[:B, :L].set(eps)

    # ---- padded, fused weights (stored (in, out)); matmul operands in dot_dtype ----
    w1 = (jnp.zeros((SCp, Hp), f32)
          .at[:S, :H].set(params["w1x"])
          .at[S:S + C, :H].set(params["w1c"])).astype(dot_dtype)
    b1 = jnp.zeros((1, Hp), f32).at[:, :H].set(params["b1"])
    w21 = jnp.zeros((Hp, Lp), f32).at[:H, :L].set(params["w21"]).astype(dot_dtype)
    b21 = jnp.zeros((1, Lp), f32).at[:, :L].set(params["b21"])
    w22 = jnp.zeros((Hp, Lp), f32).at[:H, :L].set(params["w22"]).astype(dot_dtype)
    b22 = jnp.zeros((1, Lp), f32).at[:, :L].set(params["b22"])
    w3 = (jnp.zeros((Lp, Hp), f32)
          .at[:L, :H].set(params["w3z"])
          .at[L:L + C, :H].set(params["w3c"])).astype(dot_dtype)
    b3 = jnp.zeros((1, Hp), f32).at[:, :H].set(params["b3"])
    w4 = jnp.zeros((Hp, Sp), f32).at[:H, :S].set(params["w4"]).astype(dot_dtype)
    b4 = jnp.zeros((1, Sp), f32).at[:, :S].set(params["b4"])

    def row_spec(width):                       # batch-tiled activations / outputs
        return pl.BlockSpec((TB, width), lambda i: (i, 0))

    def resident(shape):                       # weights: constant block, VMEM-resident
        return pl.BlockSpec(shape, lambda i: (0, 0))

    args = (xc, cdec, epsp, w1, b1, w21, b21, w22, b22, w3, b3, w4, b4)
    in_specs = [
        row_spec(SCp), row_spec(Lp), row_spec(Lp),
        resident(w1.shape), resident(b1.shape),
        resident(w21.shape), resident(b21.shape),
        resident(w22.shape), resident(b22.shape),
        resident(w3.shape), resident(b3.shape),
        resident(w4.shape), resident(b4.shape),
    ]
    out_specs = [row_spec(Sp), row_spec(Lp), row_spec(Lp)]
    out_shapes = (
        jax.ShapeDtypeStruct((Bp, Sp), f32),   # recon (lane-dense, padded)
        jax.ShapeDtypeStruct((Bp, Lp), f32),   # mu
        jax.ShapeDtypeStruct((Bp, Lp), f32),   # logvar
    )

    w_item = jnp.dtype(dot_dtype).itemsize
    weight_bytes = sum(int(w.size) * w_item for w in (w1, w21, w22, w3, w4))
    bias_bytes = sum(int(b.size) * 4 for b in (b1, b21, b22, b3, b4))
    act_bytes = 4 * (int(xc.size) + int(cdec.size) + int(epsp.size)) + 4 * Bp * (Sp + 2 * Lp)
    cost = pl.CostEstimate(
        flops=int(2 * Bp * (SCp * Hp + 3 * Hp * Lp + Hp * Sp)),
        transcendentals=int(Bp * (2 * Hp + Lp + Sp)),
        bytes_accessed=int(weight_bytes + bias_bytes + act_bytes),
    )

    recon_p, mu_p, logvar_p = pl.pallas_call(
        functools.partial(cvae_kernel, dot_dtype=dot_dtype),
        out_shape=out_shapes,
        grid_spec=pltpu.PrefetchScalarGridSpec(
            num_scalar_prefetch=0,
            grid=grid,
            in_specs=in_specs,
            out_specs=out_specs,
        ),
        compiler_params=pltpu.CompilerParams(
            dimension_semantics=("parallel",),          # batch axis shards across TCs (v7x)
            vmem_limit_bytes=32 * 1024 * 1024,          # safe on v5e/v6e/v7x for these tiles
        ),
        cost_estimate=cost,
    )(*args)

    # strip padding
    return recon_p[:B, :S], mu_p[:B, :L], logvar_p[:B, :L]


def init_params(key, seq_len_internal, latent_size, class_size, hidden=400):
    """Deterministic synthetic parameter init. Weights stored (in, out); biases (1, out)."""
    ks = jax.random.split(key, 10)
    scale = 0.05

    def w(k, shape):
        return scale * jax.random.normal(k, shape, dtype=jnp.float32)

    S, L, C, H = seq_len_internal, latent_size, class_size, hidden
    return {
        "w1x": w(ks[0], (S, H)), "w1c": w(ks[1], (C, H)), "b1": w(ks[2], (1, H)),
        "w21": w(ks[3], (H, L)), "b21": w(ks[4], (1, L)),
        "w22": w(ks[5], (H, L)), "b22": w(ks[6], (1, L)),
        "w3z": w(ks[7], (L, H)), "w3c": w(ks[8], (C, H)), "b3": w(ks[9], (1, H)),
        "w4": w(jax.random.fold_in(key, 100), (H, S)),
        "b4": w(jax.random.fold_in(key, 101), (1, S)),
    }


def cvae_reference(x, c, eps, p, dot_dtype=jnp.float32):
    """Pure-JAX reference matching the PyTorch forward semantics (same dot dtype)."""
    def dot(a, w):
        return jnp.dot(a.astype(dot_dtype), w.astype(dot_dtype),
                       preferred_element_type=jnp.float32)

    h1 = _elu(dot(jnp.concatenate([x, c], 1),
                  jnp.concatenate([p["w1x"], p["w1c"]], 0)) + p["b1"])
    mu = dot(h1, p["w21"]) + p["b21"]
    logvar = dot(h1, p["w22"]) + p["b22"]
    z = mu + eps * jnp.exp(0.5 * logvar)
    h3 = _elu(dot(jnp.concatenate([z, c], 1),
                  jnp.concatenate([p["w3z"], p["w3c"]], 0)) + p["b3"])
    recon = jax.nn.sigmoid(dot(h3, p["w4"]) + p["b4"])
    return recon, mu, logvar


if __name__ == "__main__":
    # Module hyper-params (small): seq_length=8 -> internal seq_length = 8*4 = 32
    seq_length = 8
    S = seq_length * 4
    latent_size = 16
    class_size = 4
    batch = 2

    key = jax.random.PRNGKey(0)
    kx, kc, keps, kp = jax.random.split(key, 4)

    # x arrives as e.g. (B, 4, seq_length) in the original pipeline; forward views it
    # as (-1, seq_length*4).  We build it already flattened: (B, S).
    x = jax.random.uniform(kx, (batch, S), dtype=jnp.float32)
    c = jax.nn.one_hot(
        jax.random.randint(kc, (batch,), 0, class_size), class_size, dtype=jnp.float32
    )
    eps = jax.random.normal(keps, (batch, latent_size), dtype=jnp.float32)

    params = init_params(kp, S, latent_size, class_size)

    # --- f32 matmul-operand path: exact check against the pure-JAX reference ---
    recon, mu, logvar = cvae_forward(x, c, eps, params, dot_dtype=jnp.float32)
    jax.block_until_ready((recon, mu, logvar))
    r_ref, mu_ref, lv_ref = cvae_reference(x, c, eps, params, dot_dtype=jnp.float32)
    assert recon.shape == (batch, S) and mu.shape == (batch, latent_size)
    assert logvar.shape == (batch, latent_size)
    assert jnp.allclose(recon, r_ref, atol=2e-5)
    assert jnp.allclose(mu, mu_ref, atol=2e-5)
    assert jnp.allclose(logvar, lv_ref, atol=2e-5)

    # --- bf16 matmul-operand path (v6e/v7x MXU), f32 accumulation & elementwise ---
    recon_b, mu_b, lv_b = cvae_forward(x, c, eps, params, dot_dtype=jnp.bfloat16)
    jax.block_until_ready((recon_b, mu_b, lv_b))
    r_refb, mu_refb, lv_refb = cvae_reference(x, c, eps, params, dot_dtype=jnp.bfloat16)
    assert jnp.allclose(recon_b, r_refb, atol=2e-3)
    assert jnp.allclose(mu_b, mu_refb, atol=2e-3)
    assert jnp.allclose(lv_b, lv_refb, atol=2e-3)

    print("KERNEL_OK")
</pallas_src>

<mosaic_0001>
module attributes {stable_mosaic.version = 11 : i64} {
  func.func @cvae_kernel(%arg0: i32, %arg1: memref<8x128xf32, #tpu.memory_space<vmem>>, %arg2: memref<8x128xf32, #tpu.memory_space<vmem>>, %arg3: memref<8x128xf32, #tpu.memory_space<vmem>>, %arg4: memref<128x512xf32, #tpu.memory_space<vmem>>, %arg5: memref<1x512xf32, #tpu.memory_space<vmem>>, %arg6: memref<512x128xf32, #tpu.memory_space<vmem>>, %arg7: memref<1x128xf32, #tpu.memory_space<vmem>>, %arg8: memref<512x128xf32, #tpu.memory_space<vmem>>, %arg9: memref<1x128xf32, #tpu.memory_space<vmem>>, %arg10: memref<128x512xf32, #tpu.memory_space<vmem>>, %arg11: memref<1x512xf32, #tpu.memory_space<vmem>>, %arg12: memref<512x128xf32, #tpu.memory_space<vmem>>, %arg13: memref<1x128xf32, #tpu.memory_space<vmem>>, %arg14: memref<8x128xf32, #tpu.memory_space<vmem>>, %arg15: memref<8x128xf32, #tpu.memory_space<vmem>>, %arg16: memref<8x128xf32, #tpu.memory_space<vmem>>) attributes {dimension_semantics = [#tpu.dimension_semantics<parallel>], iteration_bounds = array<i64: 1>, scalar_prefetch = 0 : i64, scratch_operands = 0 : i64, tpu.core_type = #tpu.core_type<tc>, window_params = [{transform_indices = @transform_0, window_bounds = array<i64: 8, 128>}, {transform_indices = @transform_1, window_bounds = array<i64: 8, 128>}, {transform_indices = @transform_2, window_bounds = array<i64: 8, 128>}, {pipeline_mode = #tpu.pipeline_mode<synchronous>, transform_indices = @transform_3, window_bounds = array<i64: 128, 512>}, {pipeline_mode = #tpu.pipeline_mode<synchronous>, transform_indices = @transform_4, window_bounds = array<i64: 1, 512>}, {pipeline_mode = #tpu.pipeline_mode<synchronous>, transform_indices = @transform_5, window_bounds = array<i64: 512, 128>}, {pipeline_mode = #tpu.pipeline_mode<synchronous>, transform_indices = @transform_6, window_bounds = array<i64: 1, 128>}, {pipeline_mode = #tpu.pipeline_mode<synchronous>, transform_indices = @transform_7, window_bounds = array<i64: 512, 128>}, {pipeline_mode = #tpu.pipeline_mode<synchronous>, transform_indices = @transform_8, window_bounds = array<i64: 1, 128>}, {pipeline_mode = #tpu.pipeline_mode<synchronous>, transform_indices = @transform_9, window_bounds = array<i64: 128, 512>}, {pipeline_mode = #tpu.pipeline_mode<synchronous>, transform_indices = @transform_10, window_bounds = array<i64: 1, 512>}, {pipeline_mode = #tpu.pipeline_mode<synchronous>, transform_indices = @transform_11, window_bounds = array<i64: 512, 128>}, {pipeline_mode = #tpu.pipeline_mode<synchronous>, transform_indices = @transform_12, window_bounds = array<i64: 1, 128>}, {transform_indices = @transform_13, window_bounds = array<i64: 8, 128>}, {transform_indices = @transform_14, window_bounds = array<i64: 8, 128>}, {transform_indices = @transform_15, window_bounds = array<i64: 8, 128>}]} {
    %c0 = arith.constant 0 : index
    %c0_0 = arith.constant 0 : index
    %0 = vector.load %arg1[%c0, %c0_0] : memref<8x128xf32, #tpu.memory_space<vmem>>, vector<8x128xf32>
    %c0_1 = arith.constant 0 : index
    %c0_2 = arith.constant 0 : index
    %1 = vector.load %arg4[%c0_1, %c0_2] : memref<128x512xf32, #tpu.memory_space<vmem>>, vector<128x512xf32>
    %cst = arith.constant dense<0.000000e+00> : vector<8x512xf32>
    %2 = tpu.matmul %0, %1, %cst {dimension_numbers = #tpu.dot_dimension_numbers<[1], [0], [0], [1], [0, 0, 1, 1], [], []>} : vector<8x128xf32>, vector<128x512xf32>, vector<8x512xf32> -> vector<8x512xf32>
    %c0_3 = arith.constant 0 : index
    %c0_4 = arith.constant 0 : index
    %3 = vector.load %arg5[%c0_3, %c0_4] : memref<1x512xf32, #tpu.memory_space<vmem>>, vector<1x512xf32>
    %4 = vector.broadcast %3 : vector<1x512xf32> to vector<8x512xf32>
    %5 = arith.addf %2, %4 : vector<8x512xf32>
    %cst_5 = arith.constant 0.000000e+00 : f32
    %6 = vector.broadcast %cst_5 : f32 to vector<8x512xf32>
    %7 = arith.cmpf ogt, %5, %6 : vector<8x512xf32>
    %cst_6 = arith.constant 0.000000e+00 : f32
    %8 = vector.broadcast %cst_6 : f32 to vector<8x512xf32>
    %9 = arith.minimumf %5, %8 : vector<8x512xf32>
    %10 = math.exp %9 : vector<8x512xf32>
    %cst_7 = arith.constant 1.000000e+00 : f32
    %11 = vector.broadcast %cst_7 : f32 to vector<8x512xf32>
    %12 = arith.subf %10, %11 : vector<8x512xf32>
    %13 = arith.select %7, %5, %12 : vector<8x512xi1>, vector<8x512xf32>
    %c0_8 = arith.constant 0 : index
    %c0_9 = arith.constant 0 : index
    %14 = vector.load %arg6[%c0_8, %c0_9] : memref<512x128xf32, #tpu.memory_space<vmem>>, vector<512x128xf32>
    %cst_10 = arith.constant dense<0.000000e+00> : vector<8x128xf32>
    %15 = tpu.matmul %13, %14, %cst_10 {dimension_numbers = #tpu.dot_dimension_numbers<[1], [0], [0], [1], [0, 0, 1, 1], [], []>} : vector<8x512xf32>, vector<512x128xf32>, vector<8x128xf32> -> vector<8x128xf32>
    %c0_11 = arith.constant 0 : index
    %c0_12 = arith.constant 0 : index
    %16 = vector.load %arg7[%c0_11, %c0_12] : memref<1x128xf32, #tpu.memory_space<vmem>>, vector<1x128xf32>
    %17 = vector.broadcast %16 : vector<1x128xf32> to vector<8x128xf32>
    %18 = arith.addf %15, %17 : vector<8x128xf32>
    %c0_13 = arith.constant 0 : index
    %c0_14 = arith.constant 0 : index
    %19 = vector.load %arg8[%c0_13, %c0_14] : memref<512x128xf32, #tpu.memory_space<vmem>>, vector<512x128xf32>
    %cst_15 = arith.constant dense<0.000000e+00> : vector<8x128xf32>
    %20 = tpu.matmul %13, %19, %cst_15 {dimension_numbers = #tpu.dot_dimension_numbers<[1], [0], [0], [1], [0, 0, 1, 1], [], []>} : vector<8x512xf32>, vector<512x128xf32>, vector<8x128xf32> -> vector<8x128xf32>
    %c0_16 = arith.constant 0 : index
    %c0_17 = arith.constant 0 : index
    %21 = vector.load %arg9[%c0_16, %c0_17] : memref<1x128xf32, #tpu.memory_space<vmem>>, vector<1x128xf32>
    %22 = vector.broadcast %21 : vector<1x128xf32> to vector<8x128xf32>
    %23 = arith.addf %20, %22 : vector<8x128xf32>
    %c0_18 = arith.constant 0 : index
    %c0_19 = arith.constant 0 : index
    %24 = vector.load %arg3[%c0_18, %c0_19] : memref<8x128xf32, #tpu.memory_space<vmem>>, vector<8x128xf32>
    %cst_20 = arith.constant 5.000000e-01 : f32
    %25 = vector.broadcast %cst_20 : f32 to vector<8x128xf32>
    %26 = arith.mulf %25, %23 : vector<8x128xf32>
    %27 = math.exp %26 : vector<8x128xf32>
    %28 = arith.mulf %24, %27 : vector<8x128xf32>
    %29 = arith.addf %18, %28 : vector<8x128xf32>
    %c0_21 = arith.constant 0 : index
    %c0_22 = arith.constant 0 : index
    %30 = vector.load %arg2[%c0_21, %c0_22] : memref<8x128xf32, #tpu.memory_space<vmem>>, vector<8x128xf32>
    %31 = arith.addf %29, %30 : vector<8x128xf32>
    %c0_23 = arith.constant 0 : index
    %c0_24 = arith.constant 0 : index
    %32 = vector.load %arg10[%c0_23, %c0_24] : memref<128x512xf32, #tpu.memory_space<vmem>>, vector<128x512xf32>
    %cst_25 = arith.constant dense<0.000000e+00> : vector<8x512xf32>
    %33 = tpu.matmul %31, %32, %cst_25 {dimension_numbers = #tpu.dot_dimension_numbers<[1], [0], [0], [1], [0, 0, 1, 1], [], []>} : vector<8x128xf32>, vector<128x512xf32>, vector<8x512xf32> -> vector<8x512xf32>
    %c0_26 = arith.constant 0 : index
    %c0_27 = arith.constant 0 : index
    %34 = vector.load %arg11[%c0_26, %c0_27] : memref<1x512xf32, #tpu.memory_space<vmem>>, vector<1x512xf32>
    %35 = vector.broadcast %34 : vector<1x512xf32> to vector<8x512xf32>
    %36 = arith.addf %33, %35 : vector<8x512xf32>
    %cst_28 = arith.constant 0.000000e+00 : f32
    %37 = vector.broadcast %cst_28 : f32 to vector<8x512xf32>
    %38 = arith.cmpf ogt, %36, %37 : vector<8x512xf32>
    %cst_29 = arith.constant 0.000000e+00 : f32
    %39 = vector.broadcast %cst_29 : f32 to vector<8x512xf32>
    %40 = arith.minimumf %36, %39 : vector<8x512xf32>
    %41 = math.exp %40 : vector<8x512xf32>
    %cst_30 = arith.constant 1.000000e+00 : f32
    %42 = vector.broadcast %cst_30 : f32 to vector<8x512xf32>
    %43 = arith.subf %41, %42 : vector<8x512xf32>
    %44 = arith.select %38, %36, %43 : vector<8x512xi1>, vector<8x512xf32>
    %c0_31 = arith.constant 0 : index
    %c0_32 = arith.constant 0 : index
    %45 = vector.load %arg12[%c0_31, %c0_32] : memref<512x128xf32, #tpu.memory_space<vmem>>, vector<512x128xf32>
    %cst_33 = arith.constant dense<0.000000e+00> : vector<8x128xf32>
    %46 = tpu.matmul %44, %45, %cst_33 {dimension_numbers = #tpu.dot_dimension_numbers<[1], [0], [0], [1], [0, 0, 1, 1], [], []>} : vector<8x512xf32>, vector<512x128xf32>, vector<8x128xf32> -> vector<8x128xf32>
    %c0_34 = arith.constant 0 : index
    %c0_35 = arith.constant 0 : index
    %47 = vector.load %arg13[%c0_34, %c0_35] : memref<1x128xf32, #tpu.memory_space<vmem>>, vector<1x128xf32>
    %48 = vector.broadcast %47 : vector<1x128xf32> to vector<8x128xf32>
    %49 = arith.addf %46, %48 : vector<8x128xf32>
    %50 = math.absf %49 : vector<8x128xf32>
    %cst_36 = arith.constant 0.000000e+00 : f32
    %51 = vector.broadcast %cst_36 : f32 to vector<8x128xf32>
    %52 = arith.subf %51, %50 : vector<8x128xf32>
    %53 = math.exp %52 : vector<8x128xf32>
    %cst_37 = arith.constant 0.000000e+00 : f32
    %54 = vector.broadcast %cst_37 : f32 to vector<8x128xf32>
    %55 = arith.cmpf oge, %49, %54 : vector<8x128xf32>
    %cst_38 = arith.constant 1.000000e+00 : f32
    %56 = vector.broadcast %cst_38 : f32 to vector<8x128xf32>
    %57 = arith.addf %56, %53 : vector<8x128xf32>
    %cst_39 = arith.constant 1.000000e+00 : f32
    %58 = vector.broadcast %cst_39 : f32 to vector<8x128xf32>
    %59 = arith.divf %58, %57 : vector<8x128xf32>
    %cst_40 = arith.constant 1.000000e+00 : f32
    %60 = vector.broadcast %cst_40 : f32 to vector<8x128xf32>
    %61 = arith.addf %60, %53 : vector<8x128xf32>
    %62 = arith.divf %53, %61 : vector<8x128xf32>
    %63 = arith.select %55, %59, %62 : vector<8x128xi1>, vector<8x128xf32>
    %c0_41 = arith.constant 0 : index
    %c0_42 = arith.constant 0 : index
    %64 = vector.load %arg14[%c0_41, %c0_42] : memref<8x128xf32, #tpu.memory_space<vmem>>, vector<8x128xf32>
    tpu.vector_store %arg14[%c0_41, %c0_42], %63 {strides = array<i32>} : memref<8x128xf32, #tpu.memory_space<vmem>>, vector<8x128xf32>,
    %c0_43 = arith.constant 0 : index
    %c0_44 = arith.constant 0 : index
    %65 = vector.load %arg15[%c0_43, %c0_44] : memref<8x128xf32, #tpu.memory_space<vmem>>, vector<8x128xf32>
    tpu.vector_store %arg15[%c0_43, %c0_44], %18 {strides = array<i32>} : memref<8x128xf32, #tpu.memory_space<vmem>>, vector<8x128xf32>,
    %c0_45 = arith.constant 0 : index
    %c0_46 = arith.constant 0 : index
    %66 = vector.load %arg16[%c0_45, %c0_46] : memref<8x128xf32, #tpu.memory_space<vmem>>, vector<8x128xf32>
    tpu.vector_store %arg16[%c0_45, %c0_46], %23 {strides = array<i32>} : memref<8x128xf32, #tpu.memory_space<vmem>>, vector<8x128xf32>,
    return
  }
  func.func @transform_0(%arg0: i32) -> (i32, i32) {
    %c0_i32 = arith.constant 0 : i32
    %c0_i32_0 = arith.constant 0 : i32
    return %arg0, %c0_i32 : i32, i32
  }
  func.func @transform_1(%arg0: i32) -> (i32, i32) {
    %c0_i32 = arith.constant 0 : i32
    %c0_i32_0 = arith.constant 0 : i32
    return %arg0, %c0_i32 : i32, i32
  }
  func.func @transform_2(%arg0: i32) -> (i32, i32) {
    %c0_i32 = arith.constant 0 : i32
    %c0_i32_0 = arith.constant 0 : i32
    return %arg0, %c0_i32 : i32, i32
  }
  func.func @transform_3(%arg0: i32) -> (i32, i32) {
    %c0_i32 = arith.constant 0 : i32
    %c0_i32_0 = arith.constant 0 : i32
    %c0_i32_1 = arith.constant 0 : i32
    return %c0_i32, %c0_i32_0 : i32, i32
  }
  func.func @transform_4(%arg0: i32) -> (i32, i32) {
    %c0_i32 = arith.constant 0 : i32
    %c0_i32_0 = arith.constant 0 : i32
    %c0_i32_1 = arith.constant 0 : i32
    return %c0_i32, %c0_i32_0 : i32, i32
  }
  func.func @transform_5(%arg0: i32) -> (i32, i32) {
    %c0_i32 = arith.constant 0 : i32
    %c0_i32_0 = arith.constant 0 : i32
    %c0_i32_1 = arith.constant 0 : i32
    return %c0_i32, %c0_i32_0 : i32, i32
  }
  func.func @transform_6(%arg0: i32) -> (i32, i32) {
    %c0_i32 = arith.constant 0 : i32
    %c0_i32_0 = arith.constant 0 : i32
    %c0_i32_1 = arith.constant 0 : i32
    return %c0_i32, %c0_i32_0 : i32, i32
  }
  func.func @transform_7(%arg0: i32) -> (i32, i32) {
    %c0_i32 = arith.constant 0 : i32
    %c0_i32_0 = arith.constant 0 : i32
    %c0_i32_1 = arith.constant 0 : i32
    return %c0_i32, %c0_i32_0 : i32, i32
  }
  func.func @transform_8(%arg0: i32) -> (i32, i32) {
    %c0_i32 = arith.constant 0 : i32
    %c0_i32_0 = arith.constant 0 : i32
    %c0_i32_1 = arith.constant 0 : i32
    return %c0_i32, %c0_i32_0 : i32, i32
  }
  func.func @transform_9(%arg0: i32) -> (i32, i32) {
    %c0_i32 = arith.constant 0 : i32
    %c0_i32_0 = arith.constant 0 : i32
    %c0_i32_1 = arith.constant 0 : i32
    return %c0_i32, %c0_i32_0 : i32, i32
  }
  func.func @transform_10(%arg0: i32) -> (i32, i32) {
    %c0_i32 = arith.constant 0 : i32
    %c0_i32_0 = arith.constant 0 : i32
    %c0_i32_1 = arith.constant 0 : i32
    return %c0_i32, %c0_i32_0 : i32, i32
  }
  func.func @transform_11(%arg0: i32) -> (i32, i32) {
    %c0_i32 = arith.constant 0 : i32
    %c0_i32_0 = arith.constant 0 : i32
    %c0_i32_1 = arith.constant 0 : i32
    return %c0_i32, %c0_i32_0 : i32, i32
  }
  func.func @transform_12(%arg0: i32) -> (i32, i32) {
    %c0_i32 = arith.constant 0 : i32
    %c0_i32_0 = arith.constant 0 : i32
    %c0_i32_1 = arith.constant 0 : i32
    return %c0_i32, %c0_i32_0 : i32, i32
  }
  func.func @transform_13(%arg0: i32) -> (i32, i32) {
    %c0_i32 = arith.constant 0 : i32
    %c0_i32_0 = arith.constant 0 : i32
    return %arg0, %c0_i32 : i32, i32
  }
  func.func @transform_14(%arg0: i32) -> (i32, i32) {
    %c0_i32 = arith.constant 0 : i32
    %c0_i32_0 = arith.constant 0 : i32
    return %arg0, %c0_i32 : i32, i32
  }
  func.func @transform_15(%arg0: i32) -> (i32, i32) {
    %c0_i32 = arith.constant 0 : i32
    %c0_i32_0 = arith.constant 0 : i32
    return %arg0, %c0_i32 : i32, i32
  }
}

</mosaic_0001>

<bundles_post_ra>
// kernel: tpu_custom_call.1
= control target key start
LH: loop header
LB: loop body
LE: loop exit
PB: predicated region body
PF: predicated region fallthrough
CT: control target
= control target key end

     0   :  { %21 = vsyncpa [#allocation3], 0  ;;  %s2505_s0 = inlined_call_operand.hbm [shape: f32[8,128], index: 0, kind: input, shape index: {}]   ;;  %s2506_s1 = inlined_call_operand.hbm [shape: f32[8,128], index: 1, kind: input, shape index: {}]   ;;  %s2507_s2 = inlined_call_operand.hbm [shape: f32[8,128], index: 2, kind: input, shape index: {}]   ;;  %s2508_s3 = inlined_call_operand.hbm [shape: f32[128,512], index: 3, kind: input, shape index: {}]   ;;  %s2509_s4 = inlined_call_operand.vmem [shape: f32[1,512], index: 4, kind: input, shape index: {}]   ;;  %s2510_s5 = inlined_call_operand.hbm [shape: f32[512,128], index: 5, kind: input, shape index: {}]   ;;  %s2511_s6 = inlined_call_operand.vmem [shape: f32[1,128], index: 6, kind: input, shape index: {}]   ;;  %s2512_s7 = inlined_call_operand.hbm [shape: f32[512,128], index: 7, kind: input, shape index: {}]   ;;  %s2513_s8 = inlined_call_operand.vmem [shape: f32[1,128], index: 8, kind: input, shape index: {}]   ;;  %s2514_s9 = inlined_call_operand.hbm [shape: f32[128,512], index: 9, kind: input, shape index: {}]   ;;  %s2515_s10 = inlined_call_operand.vmem [shape: f32[1,512], index: 10, kind: input, shape index: {}]   ;;  %s2516_s11 = inlined_call_operand.hbm [shape: f32[512,128], index: 11, kind: input, shape index: {}]   ;;  %s2517_s12 = inlined_call_operand.vmem [shape: f32[1,128], index: 12, kind: input, shape index: {}]   ;;  %s2518_s13 = inlined_call_operand.hbm [shape: f32[8,128], index: 13, kind: output, shape index: {0}]   ;;  %s2519_s14 = inlined_call_operand.hbm [shape: f32[8,128], index: 14, kind: output, shape index: {1}]   ;;  %s2520_s15 = inlined_call_operand.hbm [shape: f32[8,128], index: 15, kind: output, shape index: {2}]  }
   0x1   :  { %22 = vsyncpa [#allocation6], 0 }
   0x2   :  { %23 = vsyncpa [#allocation9], 0 }
   0x3   :  { %24 = vsyncpa [#allocation12], 0 }
   0x4   :  { %25 = vsyncpa [#allocation15], 0 }
   0x5   :  { %26 = vsyncpa [#allocation4], 0 }
   0x6   :  { %27 = vsyncpa [#allocation18], 0  ;;  %s2192_s18 = smov [#allocation5]   ;;  %s2193_s20 = smov [#allocation8]  }
   0x7   :  { %s44_s19 = sshll.u32 %s2192_s18, 4  ;;  %s63_s21 = sshll.u32 %s2193_s20, 4  ;;  %s45_s19 = int_to_ptr.vmem [resolvable:$true] %s44_s19  ;;  %s2288_s21 = int_to_ptr.vmem [resolvable:$true] %s63_s21 }
   0x8   :  { %s1936_s24 = scalar_lea.hbm %s2506_s1, 128 }
   0x9   :  { %p1937_p0 = scmp.ne.s32.totalorder %s2506_s1, %s1936_s24  ;;  %p1940_p1 = scmp.lt.u32.totalorder %s1936_s24, %s2506_s1 }
   0xb   :  { %p1942_p2 = pnand %p1940_p1, %p1937_p0 }
   0xd   :  { %1945 = shalt.err (!%p1942_p2)
}
   0xe   :  { %s1946_s29 = scalar_lea.vmem %s45_s19, 128  ;;  %p1951_p4 = scmp.lt.s32.totalorder %s45_s19, %s45_s19 }
   0xf   :  { %p1947_p3 = scmp.ne.s32.totalorder %s45_s19, %s1946_s29  ;;  %p1952_p5 = scmp.lt.s32.totalorder %s1946_s29, %s1946_s29 }
  0x11   :  { %p1953_p6 = por %p1952_p5, %p1951_p4 }
  0x13   :  { %p1954_p7 = pnand %p1953_p6, %p1947_p3 }
  0x15   :  { %1957 = shalt.err (!%p1954_p7)
}
  0x16   :  { %47 = dma.hbm_to_vmem [thread:$0]  %s2506_s1, 128, %s45_s19, [#allocation6]  }
  0x17   :  { %s1958_s20 = scalar_lea.hbm %s2508_s3, 8192 }
  0x18   :  { %p1959_p8 = scmp.ne.s32.totalorder %s2508_s3, %s1958_s20  ;;  %p1962_p9 = scmp.lt.u32.totalorder %s1958_s20, %s2508_s3 }
  0x1a   :  { %p1964_p10 = pnand %p1962_p9, %p1959_p8 }
  0x1c   :  { %1967 = shalt.err (!%p1964_p10)
}
  0x1d   :  { %s1968_s26 = scalar_lea.vmem %s2288_s21, 8192  ;;  %p1973_p12 = scmp.lt.s32.totalorder %s2288_s21, %s2288_s21 }
  0x1e   :  { %p1969_p11 = scmp.ne.s32.totalorder %s2288_s21, %s1968_s26  ;;  %p1974_p13 = scmp.lt.s32.totalorder %s1968_s26, %s1968_s26 }
  0x20   :  { %p1975_p0 = por %p1974_p13, %p1973_p12 }
  0x22   :  { %p1976_p1 = pnand %p1975_p0, %p1969_p11 }
  0x24   :  { %1979 = shalt.err (!%p1976_p1)
}
  0x25   :  { %s2194_s1 = smov 512   ;;  %s2195_s19 = smov 32  }
  0x26   :  { %69 = dma.hbm_to_vmem [thread:$0]  %s2508_s3, 8192, %s2288_s21, [#allocation9], %s2194_s1, %s2194_s1, %s2195_s19  }
  0x27   :  { %s2196_s29 = smov [#allocation11]   ;;  %s2197_s16 = smov [#allocation2]  }
  0x28   :  { %s91_s30 = sshll.u32 %s2196_s29, 4  ;;  %s34_s17 = sshll.u32 %s2197_s16, 4  ;;  %s92_s30 = int_to_ptr.vmem [resolvable:$true] %s91_s30  ;;  %s35_s17 = int_to_ptr.vmem [resolvable:$true] %s34_s17 }
  0x29   :  { %s1980_s22 = scalar_lea.hbm %s2512_s7, 8192 }
  0x2a   :  { %p1981_p2 = scmp.ne.s32.totalorder %s2512_s7, %s1980_s22  ;;  %p1984_p3 = scmp.lt.u32.totalorder %s1980_s22, %s2512_s7 }
  0x2c   :  { %p1986_p4 = pnand %p1984_p3, %p1981_p2 }
  0x2e   :  { %1989 = shalt.err (!%p1986_p4)
}
  0x2f   :  { %s1990_s3 = scalar_lea.vmem %s92_s30, 8192  ;;  %p1995_p6 = scmp.lt.s32.totalorder %s92_s30, %s92_s30 }
  0x30   :  { %p1991_p5 = scmp.ne.s32.totalorder %s92_s30, %s1990_s3  ;;  %p1996_p7 = scmp.lt.s32.totalorder %s1990_s3, %s1990_s3 }
  0x32   :  { %p1997_p8 = por %p1996_p7, %p1995_p6 }
  0x34   :  { %p1998_p9 = pnand %p1997_p8, %p1991_p5 }
  0x36   :  { %2001 = shalt.err (!%p1998_p9)
}
  0x37   :  { %s2198_s21 = smov 128   ;;  %s2199_s27 = smov 8  }
  0x38   :  { %97 = dma.hbm_to_vmem [thread:$0]  %s2512_s7, 8192, %s92_s30, [#allocation12], %s2198_s21, %s2198_s21, %s2199_s27  }
  0x39   :  { %s2002_s20 = scalar_lea.hbm %s2505_s0, 128 }
  0x3a   :  { %p2003_p10 = scmp.ne.s32.totalorder %s2505_s0, %s2002_s20  ;;  %p2006_p11 = scmp.lt.u32.totalorder %s2002_s20, %s2505_s0 }
  0x3c   :  { %p2008_p12 = pnand %p2006_p11, %p2003_p10 }
  0x3e   :  { %2011 = shalt.err (!%p2008_p12)
}
  0x3f   :  { %s2012_s26 = scalar_lea.vmem %s35_s17, 128  ;;  %p2017_p0 = scmp.lt.s32.totalorder %s35_s17, %s35_s17 }
  0x40   :  { %p2013_p13 = scmp.ne.s32.totalorder %s35_s17, %s2012_s26  ;;  %p2018_p1 = scmp.lt.s32.totalorder %s2012_s26, %s2012_s26 }
  0x42   :  { %p2019_p2 = por %p2018_p1, %p2017_p0 }
  0x44   :  { %p2020_p3 = pnand %p2019_p2, %p2013_p13 }
  0x46   :  { %2023 = shalt.err (!%p2020_p3)
}
  0x47   :  { %37 = dma.hbm_to_vmem [thread:$0]  %s2505_s0, 128, %s35_s17, [#allocation3]  }
  0x48   :  { %s2200_s3 = smov [#allocation7]   ;;  %s2201_s29 = smov [#allocation10]  }
  0x49   :  { %s54_s28 = sshll.u32 %s2200_s3, 4  ;;  %s77_s16 = sshll.u32 %s2201_s29, 4  ;;  %s55_s28 = int_to_ptr.vmem [resolvable:$true] %s54_s28  ;;  %s2349_s16 = int_to_ptr.vmem [resolvable:$true] %s77_s16 }
  0x4a   :  { %s2024_s22 = scalar_lea.hbm %s2507_s2, 128 }
  0x4b   :  { %p2025_p4 = scmp.ne.s32.totalorder %s2507_s2, %s2024_s22  ;;  %p2028_p5 = scmp.lt.u32.totalorder %s2024_s22, %s2507_s2 }
  0x4d   :  { %p2030_p6 = pnand %p2028_p5, %p2025_p4 }
  0x4f   :  { %2033 = shalt.err (!%p2030_p6)
}
  0x50   :  { %s2034_s0 = scalar_lea.vmem %s55_s28, 128  ;;  %p2039_p8 = scmp.lt.s32.totalorder %s55_s28, %s55_s28 }
  0x51   :  { %p2035_p7 = scmp.ne.s32.totalorder %s55_s28, %s2034_s0  ;;  %p2040_p9 = scmp.lt.s32.totalorder %s2034_s0, %s2034_s0 }
  0x53   :  { %p2041_p10 = por %p2040_p9, %p2039_p8 }
  0x55   :  { %p2042_p11 = pnand %p2041_p10, %p2035_p7 }
  0x57   :  { %2045 = shalt.err (!%p2042_p11)
}
  0x58   :  { %57 = dma.hbm_to_vmem [thread:$0]  %s2507_s2, 128, %s55_s28, [#allocation6]  }
  0x59   :  { %s2046_s29 = scalar_lea.hbm %s2510_s5, 8192 }
  0x5a   :  { %p2047_p12 = scmp.ne.s32.totalorder %s2510_s5, %s2046_s29  ;;  %p2050_p13 = scmp.lt.u32.totalorder %s2046_s29, %s2510_s5 }
  0x5c   :  { %p2052_p0 = pnand %p2050_p13, %p2047_p12 }
  0x5e   :  { %2055 = shalt.err (!%p2052_p0)
}
  0x5f   :  { %s2056_s24 = scalar_lea.vmem %s2349_s16, 8192  ;;  %p2061_p2 = scmp.lt.s32.totalorder %s2349_s16, %s2349_s16 }
  0x60   :  { %p2057_p1 = scmp.ne.s32.totalorder %s2349_s16, %s2056_s24  ;;  %p2062_p3 = scmp.lt.s32.totalorder %s2056_s24, %s2056_s24 }
  0x62   :  { %p2063_p4 = por %p2062_p3, %p2061_p2 }
  0x64   :  { %p2064_p5 = pnand %p2063_p4, %p2057_p1 }
  0x66   :  { %2067 = shalt.err (!%p2064_p5)
}
  0x67   :  { %83 = dma.hbm_to_vmem [thread:$0]  %s2510_s5, 8192, %s2349_s16, [#allocation9], %s2198_s21, %s2198_s21, %s2199_s27  }
  0x68   :  { %s2202_s25 = smov [#allocation13]   ;;  %s2203_s0 = smov [#allocation14]  }
  0x69   :  { %s105_s26 = sshll.u32 %s2202_s25, 4  ;;  %s119_s17 = sshll.u32 %s2203_s0, 4  ;;  %s106_s26 = int_to_ptr.vmem [resolvable:$true] %s105_s26  ;;  %s2383_s17 = int_to_ptr.vmem [resolvable:$true] %s119_s17 }
  0x6a   :  { %s2068_s3 = scalar_lea.hbm %s2514_s9, 8192 }
  0x6b   :  { %p2069_p6 = scmp.ne.s32.totalorder %s2514_s9, %s2068_s3  ;;  %p2072_p7 = scmp.lt.u32.totalorder %s2068_s3, %s2514_s9 }
  0x6d   :  { %p2074_p8 = pnand %p2072_p7, %p2069_p6 }
  0x6f   :  { %2077 = shalt.err (!%p2074_p8)
}
  0x70   :  { %s2078_s5 = scalar_lea.vmem %s106_s26, 8192  ;;  %p2083_p10 = scmp.lt.s32.totalorder %s106_s26, %s106_s26 }
  0x71   :  { %p2079_p9 = scmp.ne.s32.totalorder %s106_s26, %s2078_s5  ;;  %p2084_p11 = scmp.lt.s32.totalorder %s2078_s5, %s2078_s5 }
  0x73   :  { %p2085_p12 = por %p2084_p11, %p2083_p10 }
  0x75   :  { %p2086_p13 = pnand %p2085_p12, %p2079_p9 }
  0x77   :  { %2089 = shalt.err (!%p2086_p13)
}
  0x78   :  { %111 = dma.hbm_to_vmem [thread:$0]  %s2514_s9, 8192, %s106_s26, [#allocation12], %s2194_s1, %s2194_s1, %s2195_s19  }
  0x79   :  { %s2090_s28 = scalar_lea.hbm %s2516_s11, 8192 }
  0x7a   :  { %p2091_p0 = scmp.ne.s32.totalorder %s2516_s11, %s2090_s28  ;;  %p2094_p1 = scmp.lt.u32.totalorder %s2090_s28, %s2516_s11 }
  0x7c   :  { %p2096_p2 = pnand %p2094_p1, %p2091_p0 }
  0x7e   :  { %2099 = shalt.err (!%p2096_p2)
}
  0x7f   :  { %s2100_s3 = scalar_lea.vmem %s2383_s17, 8192  ;;  %p2105_p4 = scmp.lt.s32.totalorder %s2383_s17, %s2383_s17 }
  0x80   :  { %p2101_p3 = scmp.ne.s32.totalorder %s2383_s17, %s2100_s3  ;;  %p2106_p5 = scmp.lt.s32.totalorder %s2100_s3, %s2100_s3 }
  0x82   :  { %p2107_p6 = por %p2106_p5, %p2105_p4 }
  0x84   :  { %p2108_p7 = pnand %p2107_p6, %p2101_p3 }
  0x86   :  { %2111 = shalt.err (!%p2108_p7)
}
  0x87   :  { %125 = dma.hbm_to_vmem [thread:$0]  %s2516_s11, 8192, %s2383_s17, [#allocation15], %s2198_s21, %s2198_s21, %s2199_s27  }
  0x88   :  { %2178 = dma.done.wait [#allocation3], 128  }
  0x89   :  { %2179 = vsyncadd [#allocation3], 4294967168 }
  0x8a   :  { %2180 = dma.done.wait [#allocation6], 256  }
  0x8b   :  { %2181 = vsyncadd [#allocation6], 4294967040 }
  0x8c   :  { %2182 = dma.done.wait [#allocation9], 16384  }
  0x8d   :  { %2183 = vsyncadd [#allocation9], 4294950912 }
  0x8e   :  { %2184 = dma.done.wait [#allocation12], 16384  }
  0x8f   :  { %2185 = vsyncadd [#allocation12], 4294950912 }
  0x90   :  { %2186 = dma.done.wait [#allocation15], 8192  }
  0x91   :  { %2187 = vsyncadd [#allocation15], 4294959104  ;;  %v2204_v0 = vmov 0.0   ;;  %v154_v1 = vld [vmem:[#allocation8 + $0x8] sm:$0xff]  ;;  %v156_v3 = vld [vmem:[#allocation8 + $0x18] sm:$0xff] }
  0x92   :  { %303 = vmatprep.mubr.f32.mxu0 %v2204_v0  ;;  %374 = vmatprep.mubr.f32.mxu1 %v2204_v0  ;;  %v158_v2 = vld [vmem:[#allocation8 + $0x28] sm:$0xff]  ;;  %v160_v5 = vld [vmem:[#allocation8 + $0x38] sm:$0xff]  ;;  %v153_v6 = vld [vmem:[#allocation8] sm:$0xff] }
  0x93   :  { %v1578_v4 = vpack.c.bf16 %v158_v2, %v154_v1  ;;  %v157_v7 = vld [vmem:[#allocation8 + $0x20] sm:$0xff]  ;;  %v1610_v8 = vpack.c.bf16 %v160_v5, %v156_v3  ;;  %v155_v10 = vld [vmem:[#allocation8 + $0x10] sm:$0xff]  ;;  %v162_v12 = vld [vmem:[#allocation8 + $0x48] sm:$0xff] }
  0x94   :  { %v1580_v9 = vpack.c.bf16 %v157_v7, %v153_v6  ;;  %v159_v11 = vld [vmem:[#allocation8 + $0x30] sm:$0xff]  ;;  %v166_v14 = vld [vmem:[#allocation8 + $0x68] sm:$0xff]  ;;  %v164_v15 = vld [vmem:[#allocation8 + $0x58] sm:$0xff] }
  0x95   :  { %1579 = vmatprep.subr.bf16.mxu0 %v1578_v4  ;;  %v1612_v13 = vpack.c.bf16 %v159_v11, %v155_v10  ;;  %v168_v16 = vld [vmem:[#allocation8 + $0x78] sm:$0xff]  ;;  %1611 = vmatprep.subr.bf16.mxu1 %v1610_v8  ;;  %v1582_v17 = vpack.c.bf16 %v166_v14, %v162_v12  ;;  %v161_v19 = vld [vmem:[#allocation8 + $0x40] sm:$0xff]  ;;  %v163_v21 = vld [vmem:[#allocation8 + $0x50] sm:$0xff] }
  0x96   :  { %1581 = vmatpush1.bf16.msra.mxu0 %v1580_v9  ;;  %v1614_v18 = vpack.c.bf16 %v168_v16, %v164_v15  ;;  %v165_v20 = vld [vmem:[#allocation8 + $0x60] sm:$0xff]  ;;  %v167_v23 = vld [vmem:[#allocation8 + $0x70] sm:$0xff]  ;;  %v170_v24 = vld [vmem:[#allocation8 + $0x88] sm:$0xff] }
  0x97   :  { %1613 = vmatpush1.bf16.msra.mxu1 %v1612_v13  ;;  %v1584_v22 = vpack.c.bf16 %v165_v20, %v161_v19  ;;  %v174_v25 = vld [vmem:[#allocation8 + $0xa8] sm:$0xff]  ;;  %1583 = vmatprep.subr.bf16.mxu0 %v1582_v17  ;;  %v1616_v26 = vpack.c.bf16 %v167_v23, %v163_v21  ;;  %v172_v28 = vld [vmem:[#allocation8 + $0x98] sm:$0xff]  ;;  %v169_v30 = vld [vmem:[#allocation8 + $0x80] sm:$0xff] }
  0x98   :  { %1615 = vmatprep.subr.bf16.mxu1 %v1614_v18  ;;  %v1586_v27 = vpack.c.bf16 %v174_v25, %v170_v24  ;;  %v176_v29 = vld [vmem:[#allocation8 + $0xb8] sm:$0xff]  ;;  %v173_v32 = vld [vmem:[#allocation8 + $0xa0] sm:$0xff]  ;;  %v171_v33 = vld [vmem:[#allocation8 + $0x90] sm:$0xff] }
  0x99   :  { %v1618_v31 = vpack.c.bf16 %v176_v29, %v172_v28  ;;  %v175_v34 = vld [vmem:[#allocation8 + $0xb0] sm:$0xff]  ;;  %v1588_v35 = vpack.c.bf16 %v173_v32, %v169_v30  ;;  %v178_v36 = vld [vmem:[#allocation8 + $0xc8] sm:$0xff]  ;;  %v180_v38 = vld [vmem:[#allocation8 + $0xd8] sm:$0xff] }
  0x9a   :  { %1585 = vmatpush1.bf16.msra.mxu0 %v1584_v22  ;;  %v182_v37 = vld [vmem:[#allocation8 + $0xe8] sm:$0xff]  ;;  %v1620_v39 = vpack.c.bf16 %v175_v34, %v171_v33  ;;  %v184_v41 = vld [vmem:[#allocation8 + $0xf8] sm:$0xff]  ;;  %v177_v42 = vld [vmem:[#allocation8 + $0xc0] sm:$0xff] }
  0x9b   :  { %1617 = vmatpush1.bf16.msra.mxu1 %v1616_v26  ;;  %1587 = vmatprep.subr.bf16.mxu0 %v1586_v27  ;;  %v1590_v40 = vpack.c.bf16 %v182_v37, %v178_v36  ;;  %v181_v43 = vld [vmem:[#allocation8 + $0xe0] sm:$0xff]  ;;  %v1622_v44 = vpack.c.bf16 %v184_v41, %v180_v38  ;;  %v179_v45 = vld [vmem:[#allocation8 + $0xd0] sm:$0xff]  ;;  %v186_v47 = vld [vmem:[#allocation8 + $0x108] sm:$0xff] }
  0x9c   :  { %1619 = vmatprep.subr.bf16.mxu1 %v1618_v31  ;;  %v183_v46 = vld [vmem:[#allocation8 + $0xf0] sm:$0xff]  ;;  %v190_v48 = vld [vmem:[#allocation8 + $0x128] sm:$0xff]  ;;  %v188_v49 = vld [vmem:[#allocation8 + $0x118] sm:$0xff]  ;;  %v1592_v51 = vpack.c.bf16 %v181_v43, %v177_v42 }
  0x9d   :  { %v192_v50 = vld [vmem:[#allocation8 + $0x138] sm:$0xff]  ;;  %v1624_v52 = vpack.c.bf16 %v183_v46, %v179_v45  ;;  %v1594_v53 = vpack.c.bf16 %v190_v48, %v186_v47  ;;  %v185_v54 = vld [vmem:[#allocation8 + $0x100] sm:$0xff]  ;;  %v187_v56 = vld [vmem:[#allocation8 + $0x110] sm:$0xff] }
  0x9e   :  { %1589 = vmatpush1.bf16.msra.mxu0 %v1588_v35  ;;  %v189_v55 = vld [vmem:[#allocation8 + $0x120] sm:$0xff]  ;;  %v1626_v57 = vpack.c.bf16 %v192_v50, %v188_v49  ;;  %v191_v58 = vld [vmem:[#allocation8 + $0x130] sm:$0xff]  ;;  %v194_v59 = vld [vmem:[#allocation8 + $0x148] sm:$0xff] }
  0x9f   :  { %1621 = vmatpush1.bf16.msra.mxu1 %v1620_v39  ;;  %1591 = vmatprep.subr.bf16.mxu0 %v1590_v40  ;;  %v198_v60 = vld [vmem:[#allocation8 + $0x168] sm:$0xff]  ;;  %v196_v61 = vld [vmem:[#allocation8 + $0x158] sm:$0xff]  ;;  %v1596_v63 = vpack.c.bf16 %v189_v55, %v185_v54  ;;  %v1628_v1 = vpack.c.bf16 %v191_v58, %v187_v56  ;;  %v193_v3 = vld [vmem:[#allocation8 + $0x140] sm:$0xff] }
  0xa0   :  { %1623 = vmatprep.subr.bf16.mxu1 %v1622_v44  ;;  %v200_v62 = vld [vmem:[#allocation8 + $0x178] sm:$0xff]  ;;  %v1598_v2 = vpack.c.bf16 %v198_v60, %v194_v59  ;;  %v197_v4 = vld [vmem:[#allocation8 + $0x160] sm:$0xff]  ;;  %v195_v5 = vld [vmem:[#allocation8 + $0x150] sm:$0xff] }
  0xa1   :  { %v1630_v6 = vpack.c.bf16 %v200_v62, %v196_v61  ;;  %v199_v7 = vld [vmem:[#allocation8 + $0x170] sm:$0xff]  ;;  %v202_v8 = vld [vmem:[#allocation8 + $0x188] sm:$0xff]  ;;  %v204_v10 = vld [vmem:[#allocation8 + $0x198] sm:$0xff]  ;;  %v1600_v12 = vpack.c.bf16 %v197_v4, %v193_v3 }
  0xa2   :  { %1593 = vmatpush1.bf16.msra.mxu0 %v1592_v51  ;;  %v206_v9 = vld [vmem:[#allocation8 + $0x1a8] sm:$0xff]  ;;  %v208_v11 = vld [vmem:[#allocation8 + $0x1b8] sm:$0xff]  ;;  %v1632_v13 = vpack.c.bf16 %v199_v7, %v195_v5  ;;  %v201_v15 = vld [vmem:[#allocation8 + $0x180] sm:$0xff] }
  0xa3   :  { %1625 = vmatpush1.bf16.msra.mxu1 %v1624_v52  ;;  %1595 = vmatprep.subr.bf16.mxu0 %v1594_v53  ;;  %v1602_v14 = vpack.c.bf16 %v206_v9, %v202_v8  ;;  %v205_v16 = vld [vmem:[#allocation8 + $0x1a0] sm:$0xff]  ;;  %v203_v17 = vld [vmem:[#allocation8 + $0x190] sm:$0xff]  ;;  %v1634_v18 = vpack.c.bf16 %v208_v11, %v204_v10  ;;  %v210_v20 = vld [vmem:[#allocation8 + $0x1c8] sm:$0xff] }
  0xa4   :  { %1627 = vmatprep.subr.bf16.mxu1 %v1626_v57  ;;  %v207_v19 = vld [vmem:[#allocation8 + $0x1b0] sm:$0xff]  ;;  %v214_v21 = vld [vmem:[#allocation8 + $0x1e8] sm:$0xff]  ;;  %v212_v22 = vld [vmem:[#allocation8 + $0x1d8] sm:$0xff]  ;;  %v1604_v24 = vpack.c.bf16 %v205_v16, %v201_v15 }
  0xa5   :  { %v216_v23 = vld [vmem:[#allocation8 + $0x1f8] sm:$0xff]  ;;  %v1636_v25 = vpack.c.bf16 %v207_v19, %v203_v17  ;;  %v1606_v26 = vpack.c.bf16 %v214_v21, %v210_v20  ;;  %v209_v27 = vld [vmem:[#allocation8 + $0x1c0] sm:$0xff]  ;;  %v211_v29 = vld [vmem:[#allocation8 + $0x1d0] sm:$0xff] }
  0xa6   :  { %1597 = vmatpush1.bf16.msra.mxu0 %v1596_v63  ;;  %v213_v28 = vld [vmem:[#allocation8 + $0x1e0] sm:$0xff]  ;;  %v1638_v30 = vpack.c.bf16 %v216_v23, %v212_v22  ;;  %v215_v31 = vld [vmem:[#allocation8 + $0x1f0] sm:$0xff]  ;;  %v422_v33 = vld [vmem:[#allocation10 + $0x88] sm:$0xff] }
  0xa7   :  { %1629 = vmatpush1.bf16.msra.mxu1 %v1628_v1  ;;  %1599 = vmatprep.subr.bf16.mxu0 %v1598_v2  ;;  %v421_v32 = vld [vmem:[#allocation10 + $0x80] sm:$0xff]  ;;  %v454_v35 = vld [vmem:[#allocation10 + $0x188] sm:$0xff]  ;;  %v1608_v36 = vpack.c.bf16 %v213_v28, %v209_v27  ;;  %v1640_v37 = vpack.c.bf16 %v215_v31, %v211_v29  ;;  %v423_v44 = vld [vmem:[#allocation10 + $0x90] sm:$0xff] }
  0xa8   :  { %1631 = vmatprep.subr.bf16.mxu1 %v1630_v6  ;;  %v453_v34 = vld [vmem:[#allocation10 + $0x180] sm:$0xff]  ;;  %v1642_v38 = vpack.c.bf16 %v422_v33, %v421_v32  ;;  %v406_v40 = vld [vmem:[#allocation10 + $0x8] sm:$0xff]  ;;  %v424_v45 = vld [vmem:[#allocation10 + $0x98] sm:$0xff] }
  0xa9   :  { %v405_v39 = vld [vmem:[#allocation10] sm:$0xff]  ;;  %v1674_v42 = vpack.c.bf16 %v454_v35, %v453_v34  ;;  %v438_v43 = vld [vmem:[#allocation10 + $0x108] sm:$0xff]  ;;  %v455_v46 = vld [vmem:[#allocation10 + $0x190] sm:$0xff]  ;;  %v1646_v51 = vpack.c.bf16 %v424_v45, %v423_v44 }
  0xaa   :  { %1601 = vmatpush1.bf16.msra.mxu0 %v1600_v12  ;;  %v437_v41 = vld [vmem:[#allocation10 + $0x100] sm:$0xff]  ;;  %v456_v47 = vld [vmem:[#allocation10 + $0x198] sm:$0xff]  ;;  %v152_v48 = vld [vmem:[#allocation2] sm:$0xff]  ;;  %v1644_v49 = vpack.c.bf16 %v406_v40, %v405_v39 }
  0xab   :  { %1633 = vmatpush1.bf16.msra.mxu1 %v1632_v13  ;;  %1603 = vmatprep.subr.bf16.mxu0 %v1602_v14  ;;  %v1676_v50 = vpack.c.bf16 %v438_v43, %v437_v41  ;;  %v407_v52 = vld [vmem:[#allocation10 + $0x10] sm:$0xff]  ;;  %v408_v53 = vld [vmem:[#allocation10 + $0x18] sm:$0xff]  ;;  %v1678_v55 = vpack.c.bf16 %v456_v47, %v455_v46  ;;  %v425_v57 = vld [vmem:[#allocation10 + $0xa0] sm:$0xff] }
  0xac   :  { %1635 = vmatprep.subr.bf16.mxu1 %v1634_v18  ;;  %v439_v54 = vld [vmem:[#allocation10 + $0x110] sm:$0xff]  ;;  %v440_v56 = vld [vmem:[#allocation10 + $0x118] sm:$0xff]  ;;  %v426_v58 = vld [vmem:[#allocation10 + $0xa8] sm:$0xff]  ;;  %v1648_v61 = vpack.c.bf16 %v408_v53, %v407_v52 }
  0xad   :  { %v457_v59 = vld [vmem:[#allocation10 + $0x1a0] sm:$0xff]  ;;  %v458_v60 = vld [vmem:[#allocation10 + $0x1a8] sm:$0xff]  ;;  %v1680_v62 = vpack.c.bf16 %v440_v56, %v439_v54  ;;  %v1650_v63 = vpack.c.bf16 %v426_v58, %v425_v57  ;;  %v427_v8 = vld [vmem:[#allocation10 + $0xb0] sm:$0xff] }
  0xae   :  { %1605 = vmatpush1.bf16.msra.mxu0 %v1604_v24  ;;  %v409_v1 = vld [vmem:[#allocation10 + $0x20] sm:$0xff]  ;;  %v410_v2 = vld [vmem:[#allocation10 + $0x28] sm:$0xff]  ;;  %v1682_v3 = vpack.c.bf16 %v458_v60, %v457_v59  ;;  %v428_v9 = vld [vmem:[#allocation10 + $0xb8] sm:$0xff] }
  0xaf   :  { %1637 = vmatpush1.bf16.msra.mxu1 %v1636_v25  ;;  %1607 = vmatprep.subr.bf16.mxu0 %v1606_v26  ;;  %v441_v4 = vld [vmem:[#allocation10 + $0x120] sm:$0xff]  ;;  %v442_v5 = vld [vmem:[#allocation10 + $0x128] sm:$0xff]  ;;  %v1652_v6 = vpack.c.bf16 %v410_v2, %v409_v1  ;;  %v459_v10 = vld [vmem:[#allocation10 + $0x1b0] sm:$0xff]  ;;  %v1654_v11 = vpack.c.bf16 %v428_v9, %v427_v8 }
  0xb0   :  { %1639 = vmatprep.subr.bf16.mxu1 %v1638_v30  ;;  %v1684_v7 = vpack.c.bf16 %v442_v5, %v441_v4  ;;  %v460_v12 = vld [vmem:[#allocation10 + $0x1b8] sm:$0xff]  ;;  %v411_v13 = vld [vmem:[#allocation10 + $0x30] sm:$0xff]  ;;  %v429_v20 = vld [vmem:[#allocation10 + $0xc0] sm:$0xff] }
  0xb1   :  { %v412_v14 = vld [vmem:[#allocation10 + $0x38] sm:$0xff]  ;;  %v1686_v15 = vpack.c.bf16 %v460_v12, %v459_v10  ;;  %v443_v17 = vld [vmem:[#allocation10 + $0x130] sm:$0xff]  ;;  %v430_v21 = vld [vmem:[#allocation10 + $0xc8] sm:$0xff] }
  0xb2   :  { %1609 = vmatpush1.bf16.msra.mxu0 %v1608_v36  ;;  %v1656_v16 = vpack.c.bf16 %v412_v14, %v411_v13  ;;  %v444_v18 = vld [vmem:[#allocation10 + $0x138] sm:$0xff]  ;;  %v461_v22 = vld [vmem:[#allocation10 + $0x1c0] sm:$0xff]  ;;  %v1658_v23 = vpack.c.bf16 %v430_v21, %v429_v20  ;;  %v462_v24 = vld [vmem:[#allocation10 + $0x1c8] sm:$0xff] }
  0xb3   :  { %1641 = vmatpush1.bf16.msra.mxu1 %v1640_v37  ;;  %1643 = vmatprep.subr.bf16.mxu0 %v1642_v38  ;;  %v1688_v19 = vpack.c.bf16 %v444_v18, %v443_v17  ;;  %v413_v25 = vld [vmem:[#allocation10 + $0x40] sm:$0xff]  ;;  %v414_v26 = vld [vmem:[#allocation10 + $0x48] sm:$0xff]  ;;  %v1690_v27 = vpack.c.bf16 %v462_v24, %v461_v22  ;;  %v431_v32 = vld [vmem:[#allocation10 + $0xd0] sm:$0xff] }
  0xb4   :  { %1675 = vmatprep.subr.bf16.mxu1 %v1674_v42  ;;  %v1660_v28 = vpack.c.bf16 %v414_v26, %v413_v25  ;;  %v445_v29 = vld [vmem:[#allocation10 + $0x140] sm:$0xff]  ;;  %v446_v30 = vld [vmem:[#allocation10 + $0x148] sm:$0xff]  ;;  %v432_v33 = vld [vmem:[#allocation10 + $0xd8] sm:$0xff] }
  0xb5   :  { %304 = vmatmul.mubr.f32.vlgmr.msra.gmra.mrb[0].mxu0 %v152_v48  ;;  %v1692_v31 = vpack.c.bf16 %v446_v30, %v445_v29  ;;  %v463_v34 = vld [vmem:[#allocation10 + $0x1d0] sm:$0xff]  ;;  %v1662_v35 = vpack.c.bf16 %v432_v33, %v431_v32  ;;  %v464_v36 = vld [vmem:[#allocation10 + $0x1d8] sm:$0xff]  ;;  %v433_v43 = vld [vmem:[#allocation10 + $0xe0] sm:$0xff] }
  0xb6   :  { %375 = vmatmul.mubr.f32.vlgmr.msra.gmra.mrb[0].mxu1 %v152_v48  ;;  %1645 = vmatpush3.bf16.msra.mxu0 %v1644_v49  ;;  %v415_v37 = vld [vmem:[#allocation10 + $0x50] sm:$0xff]  ;;  %v416_v38 = vld [vmem:[#allocation10 + $0x58] sm:$0xff]  ;;  %v1694_v39 = vpack.c.bf16 %v464_v36, %v463_v34  ;;  %v434_v45 = vld [vmem:[#allocation10 + $0xe8] sm:$0xff] }
  0xb7   :  { %1677 = vmatpush3.bf16.msra.mxu1 %v1676_v50  ;;  %1647 = vmatprep.subr.bf16.mxu0 %v1646_v51  ;;  %v1664_v40 = vpack.c.bf16 %v416_v38, %v415_v37  ;;  %v447_v41 = vld [vmem:[#allocation10 + $0x150] sm:$0xff]  ;;  %v448_v42 = vld [vmem:[#allocation10 + $0x158] sm:$0xff]  ;;  %v465_v46 = vld [vmem:[#allocation10 + $0x1e0] sm:$0xff]  ;;  %v1666_v48 = vpack.c.bf16 %v434_v45, %v433_v43 }
  0xb8   :  { %1679 = vmatprep.subr.bf16.mxu1 %v1678_v55  ;;  %v1696_v44 = vpack.c.bf16 %v448_v42, %v447_v41  ;;  %v466_v47 = vld [vmem:[#allocation10 + $0x1e8] sm:$0xff]  ;;  %v417_v50 = vld [vmem:[#allocation10 + $0x60] sm:$0xff]  ;;  %v435_v55 = vld [vmem:[#allocation10 + $0xf0] sm:$0xff] }
  0xb9   :  { %v1698_v49 = vpack.c.bf16 %v466_v47, %v465_v46  ;;  %v418_v51 = vld [vmem:[#allocation10 + $0x68] sm:$0xff]  ;;  %v449_v52 = vld [vmem:[#allocation10 + $0x160] sm:$0xff]  ;;  %v436_v56 = vld [vmem:[#allocation10 + $0xf8] sm:$0xff] }
  0xba   :  { %1649 = vmatpush3.bf16.msra.mxu0 %v1648_v61  ;;  %v1668_v53 = vpack.c.bf16 %v418_v51, %v417_v50  ;;  %v450_v54 = vld [vmem:[#allocation10 + $0x168] sm:$0xff]  ;;  %v1670_v58 = vpack.c.bf16 %v436_v56, %v435_v55  ;;  %v467_v59 = vld [vmem:[#allocation10 + $0x1f0] sm:$0xff]  ;;  %v468_v60 = vld [vmem:[#allocation10 + $0x1f8] sm:$0xff] }
  0xbb   :  { %1681 = vmatpush3.bf16.msra.mxu1 %v1680_v62  ;;  %1651 = vmatprep.subr.bf16.mxu0 %v1650_v63  ;;  %v1700_v57 = vpack.c.bf16 %v450_v54, %v449_v52  ;;  %v419_v61 = vld [vmem:[#allocation10 + $0x70] sm:$0xff]  ;;  %v1702_v62 = vpack.c.bf16 %v468_v60, %v467_v59  ;;  %v420_v63 = vld [vmem:[#allocation10 + $0x78] sm:$0xff]  ;;  %v632_v5 = vld [vmem:[#allocation11 + $0x80] sm:$0xff] }
  0xbc   :  { %1683 = vmatprep.subr.bf16.mxu1 %v1682_v3  ;;  %v451_v1 = vld [vmem:[#allocation10 + $0x170] sm:$0xff]  ;;  %v452_v2 = vld [vmem:[#allocation10 + $0x178] sm:$0xff]  ;;  %v1672_v3 = vpack.c.bf16 %v420_v63, %v419_v61  ;;  %v665_v9 = vld [vmem:[#allocation11 + $0x188] sm:$0xff] }
  0xbd   :  { %v1704_v4 = vpack.c.bf16 %v452_v2, %v451_v1  ;;  %v217_v14 = vld [vmem:[%s2509_s4] sm:$0xf]  ;;  %v635_v50 = vld [vmem:[#allocation11 + $0x98] sm:$0xff]  ;;  %v650_v59 = vld [vmem:[#allocation11 + $0x110] sm:$0xff] }
  0xbe   :  { %1653 = vmatpush3.bf16.msra.mxu0 %v1652_v6  ;;  %v633_v6 = vld [vmem:[#allocation11 + $0x88] sm:$0xff]  ;;  %v667_v54 = vld [vmem:[#allocation11 + $0x198] sm:$0xff]  ;;  %v636_v1 = vld [vmem:[#allocation11 + $0xa0] sm:$0xff] }
  0xbf   :  { %1685 = vmatpush3.bf16.msra.mxu1 %v1684_v7  ;;  %1655 = vmatprep.subr.bf16.mxu0 %v1654_v11  ;;  %v664_v7 = vld [vmem:[#allocation11 + $0x180] sm:$0xff]  ;;  %v1706_v8 = vpack.c.bf16 %v633_v6, %v632_v5  ;;  %v219_v11 = vlaneseq  ;;  %v617_v41 = vld [vmem:[#allocation11 + $0x8] sm:$0xff]  ;;  %v651_v63 = vld [vmem:[#allocation11 + $0x118] sm:$0xff] }
  0xc0   :  { %1687 = vmatprep.subr.bf16.mxu1 %v1686_v15  ;;  %v1738_v10 = vpack.c.bf16 %v665_v9, %v664_v7  ;;  %v649_v45 = vld [vmem:[#allocation11 + $0x108] sm:$0xff]  ;;  %v668_v5 = vld [vmem:[#allocation11 + $0x1a0] sm:$0xff] }
  0xc1   :  { %v2422_v12 = vshrl.u32 %v219_v11, 7  ;;  %v637_v2 = vld [vmem:[#allocation11 + $0xa8] sm:$0xff] }
  0xc2   :  { %1657 = vmatpush3.bf16.msra.mxu0 %v1656_v16  ;;  %v669_v6 = vld [vmem:[#allocation11 + $0x1a8] sm:$0xff]  ;;  %v1714_v9 = vpack.c.bf16 %v637_v2, %v636_v1  ;;  %v628_v1 = vld [vmem:[#allocation11 + $0x60] sm:$0xff] }
  0xc3   :  { %1689 = vmatpush3.bf16.msra.mxu1 %v1688_v19  ;;  %1659 = vmatprep.subr.bf16.mxu0 %v1658_v23  ;;  %v221_v13 = vsub.s32 0, %v2422_v12  ;;  %v229_v15 = vsub.s32 2, %v2422_v12  ;;  %v225_v16 = vsub.s32 1, %v2422_v12  ;;  %v233_v17 = vsub.s32 3, %v2422_v12  ;;  %v621_v11 = vld [vmem:[#allocation11 + $0x28] sm:$0xff] }
  0xc4   :  { %1691 = vmatprep.subr.bf16.mxu1 %v1690_v27  ;;  %v629_v2 = vld [vmem:[#allocation11 + $0x68] sm:$0xff] }
  0xc5   :  { %v222_v18 = vrot.slane %v217_v14, %v221_v13  ;;  %v230_v19 = vrot.slane %v217_v14, %v229_v15  ;;  %v226_v20 = vrot.slane %v217_v14, %v225_v16  ;;  %v234_v21 = vrot.slane %v217_v14, %v233_v17  ;;  %v652_v14 = vld [vmem:[#allocation11 + $0x120] sm:$0xff] }
  0xc6   :  { %1661 = vmatpush3.bf16.msra.mxu0 %v1660_v28 }
  0xc7   :  { %1693 = vmatpush3.bf16.msra.mxu1 %v1692_v31  ;;  %1663 = vmatprep.subr.bf16.mxu0 %v1662_v35 }
  0xc8   :  { %1695 = vmatprep.subr.bf16.mxu1 %v1694_v39 }
  0xca   :  { %1665 = vmatpush3.bf16.msra.mxu0 %v1664_v40  ;;  %v616_v40 = vld [vmem:[#allocation11] sm:$0xff] }
  0xcb   :  { %1697 = vmatpush3.bf16.msra.mxu1 %v1696_v44  ;;  %1667 = vmatprep.subr.bf16.mxu0 %v1666_v48  ;;  %v648_v44 = vld [vmem:[#allocation11 + $0x100] sm:$0xff]  ;;  %v1708_v52 = vpack.c.bf16 %v617_v41, %v616_v40  ;;  %v625_v40 = vld [vmem:[#allocation11 + $0x48] sm:$0xff] }
  0xcc   :  { %1699 = vmatprep.subr.bf16.mxu1 %v1698_v49  ;;  %v634_v49 = vld [vmem:[#allocation11 + $0x90] sm:$0xff]  ;;  %v1740_v56 = vpack.c.bf16 %v649_v45, %v648_v44  ;;  %v656_v41 = vld [vmem:[#allocation11 + $0x140] sm:$0xff]  ;;  %v643_v45 = vld [vmem:[#allocation11 + $0xd8] sm:$0xff] }
  0xcd   :  { %v642_v44 = vld [vmem:[#allocation11 + $0xd0] sm:$0xff] }
  0xce   :  { %1669 = vmatpush3.bf16.msra.mxu0 %v1668_v53  ;;  %v666_v53 = vld [vmem:[#allocation11 + $0x190] sm:$0xff] }
  0xcf   :  { %1701 = vmatpush3.bf16.msra.mxu1 %v1700_v57  ;;  %1671 = vmatprep.subr.bf16.mxu0 %v1670_v58  ;;  %v618_v57 = vld [vmem:[#allocation11 + $0x10] sm:$0xff]  ;;  %v619_v58 = vld [vmem:[#allocation11 + $0x18] sm:$0xff] }
  0xd0   :  { %1703 = vmatprep.subr.bf16.mxu1 %v1702_v62  ;;  %v1710_v62 = vpack.c.bf16 %v635_v50, %v634_v49  ;;  %v1712_v7 = vpack.c.bf16 %v619_v58, %v618_v57  ;;  %v1726_v50 = vpack.c.bf16 %v643_v45, %v642_v44  ;;  %v645_v57 = vld [vmem:[#allocation11 + $0xe8] sm:$0xff]  ;;  %v676_v58 = vld [vmem:[#allocation11 + $0x1e0] sm:$0xff]  ;;  %v845_v44 = vld [vmem:[#allocation13 + $0x50] sm:$0xff] }
  0xd1   :  { %v849_v45 = vld [vmem:[#allocation13 + $0x70] sm:$0xff] }
  0xd2   :  { %1673 = vmatpush3.bf16.msra.mxu0 %v1672_v3 }
  0xd3   :  { %1705 = vmatpush3.bf16.msra.mxu1 %v1704_v4  ;;  %1707 = vmatprep.subr.bf16.mxu0 %v1706_v8  ;;  %v1742_v4 = vpack.c.bf16 %v667_v54, %v666_v53  ;;  %v1744_v8 = vpack.c.bf16 %v651_v63, %v650_v59  ;;  %v658_v53 = vld [vmem:[#allocation11 + $0x150] sm:$0xff]  ;;  %v677_v59 = vld [vmem:[#allocation11 + $0x1e8] sm:$0xff] }
  0xd4   :  { %1739 = vmatprep.subr.bf16.mxu1 %v1738_v10  ;;  %v620_v10 = vld [vmem:[#allocation11 + $0x20] sm:$0xff] }
 0x188   :  { %v305_v22 = vpop.f32.mrb[0].mxu0 }
 0x189   :  { %v306_v23 = vadd.f32 %v305_v22, %v222_v18  ;;  %v376_v24 = vpop.f32.mrb[0].mxu1  ;;  %v307_v25 = vpop.f32.mrb[1].mxu0  ;;  %v1746_v18 = vpack.c.bf16 %v669_v6, %v668_v5  ;;  %v670_v22 = vld [vmem:[#allocation11 + $0x1b0] sm:$0xff]  ;;  %v1762_v5 = vpack.c.bf16 %v677_v59, %v676_v58  ;;  %v661_v6 = vld [vmem:[#allocation11 + $0x168] sm:$0xff] }
 0x18a   :  { %v377_v26 = vadd.f32 %v376_v24, %v230_v19  ;;  %v308_v27 = vadd.f32 %v307_v25, %v226_v20  ;;  %v378_v28 = vpop.f32.mrb[1].mxu1  ;;  %v653_v19 = vld [vmem:[#allocation11 + $0x128] sm:$0xff]  ;;  %v638_v20 = vld [vmem:[#allocation11 + $0xb0] sm:$0xff]  ;;  %v1716_v24 = vpack.c.bf16 %v621_v11, %v620_v10  ;;  %v679_v10 = vld [vmem:[#allocation11 + $0x1f8] sm:$0xff]  ;;  %v1732_v11 = vpack.c.bf16 %v629_v2, %v628_v1 }
 0x18b   :  { %v385_v29 = vmin.f32 %v306_v23, 0.0  ;;  %v379_v30 = vadd.f32 %v378_v28, %v234_v21  ;;  %vm381_vm1 = vcmp.gt.f32.partialorder %v306_v23, 0.0  ;;  %v639_v21 = vld [vmem:[#allocation11 + $0xb8] sm:$0xff]  ;;  %v1748_v25 = vpack.c.bf16 %v653_v19, %v652_v14  ;;  %v630_v19 = vld [vmem:[#allocation11 + $0x70] sm:$0xff]  ;;  %v860_v59 = vld [vmem:[#allocation13 + $0xc8] sm:$0xff] }
 0x18c   :  { %v387_v31 = vmin.f32 %v377_v26, 0.0  ;;  %v386_v32 = vmin.f32 %v308_v27, 0.0  ;;  %vm382_vm0 = vcmp.gt.f32.partialorder %v308_v27, 0.0  ;;  %vm383_vm3 = vcmp.gt.f32.partialorder %v377_v26, 0.0  ;;  %v623_v28 = vld [vmem:[#allocation11 + $0x38] sm:$0xff]  ;;  %v859_v2 = vld [vmem:[#allocation13 + $0xc0] sm:$0xff] }
 0x18d   :  { %v389_v33 = vmul.f32 1.442695, %v385_v29  ;;  %v388_v34 = vmin.f32 %v379_v30, 0.0  ;;  %vm384_vm2 = vcmp.gt.f32.partialorder %v379_v30, 0.0  ;;  %v654_v29 = vld [vmem:[#allocation11 + $0x130] sm:$0xff]  ;;  %v866_v1 = vld [vmem:[#allocation13 + $0xf8] sm:$0xff] }
 0x18e   :  { %v393_v35 = vmul.f32 1.442695, %v387_v31  ;;  %v391_v36 = vmul.f32 1.442695, %v386_v32  ;;  %v655_v31 = vld [vmem:[#allocation11 + $0x138] sm:$0xff]  ;;  %v640_v32 = vld [vmem:[#allocation11 + $0xc0] sm:$0xff] }
 0x18f   :  { %1914 = vpow2.f32 %v389_v33  ;;  %v395_v37 = vmul.f32 1.442695, %v388_v34  ;;  %v641_v33 = vld [vmem:[#allocation11 + $0xc8] sm:$0xff]  ;;  %v672_v34 = vld [vmem:[#allocation11 + $0x1c0] sm:$0xff] }
 0x190   :  { %1916 = vpow2.f32 %v393_v35  ;;  %v673_v35 = vld [vmem:[#allocation11 + $0x1c8] sm:$0xff] }
 0x191   :  { %1918 = vpow2.f32 %v391_v36 }
 0x192   :  { %1920 = vpow2.f32 %v395_v37  ;;  %v1752_v37 = vpack.c.bf16 %v655_v31, %v654_v29  ;;  %v835_v31 = vld [vmem:[#allocation13] sm:$0xff] }
 0x199   :  { %v1915_v38 = vpop.eup %1914 }
 0x19a   :  { %v1917_v39 = vpop.eup %1916  ;;  %v1357_v43 = vadd.f32 -1.0, %v1915_v38  ;;  %v1722_v38 = vpack.c.bf16 %v641_v33, %v640_v32  ;;  %v839_v32 = vld [vmem:[#allocation13 + $0x20] sm:$0xff] }
 0x19b   :  { %v1919_v42 = vpop.eup %1918  ;;  %v1359_v48 = vadd.f32 -1.0, %v1917_v39  ;;  %v624_v39 = vld [vmem:[#allocation11 + $0x40] sm:$0xff] }
 0x19c   :  { %v1921_v46 = vpop.eup %1920  ;;  %v1358_v47 = vadd.f32 -1.0, %v1919_v42  ;;  %v2439_v61 = vsel %vm381_vm1, %v306_v23, %v1357_v43  ;;  %v671_v23 = vld [vmem:[#allocation11 + $0x1b8] sm:$0xff]  ;;  %v1754_v42 = vpack.c.bf16 %v673_v35, %v672_v34  ;;  %v657_v43 = vld [vmem:[#allocation11 + $0x148] sm:$0xff]  ;;  %v1772_v34 = vpack.c.bf16 %v839_v32, %v835_v31  ;;  %v837_v35 = vld [vmem:[#allocation13 + $0x10] sm:$0xff] }
 0x19d   :  { %v1360_v51 = vadd.f32 -1.0, %v1921_v46  ;;  %v2442_v3 = vsel %vm383_vm3, %v377_v26, %v1359_v48  ;;  %v1718_v26 = vpack.c.bf16 %v639_v21, %v638_v20  ;;  %v674_v46 = vld [vmem:[#allocation11 + $0x1d0] sm:$0xff]  ;;  %v1724_v48 = vpack.c.bf16 %v625_v40, %v624_v39  ;;  %v631_v20 = vld [vmem:[#allocation11 + $0x78] sm:$0xff]  ;;  %v843_v40 = vld [vmem:[#allocation13 + $0x40] sm:$0xff] }
 0x19e   :  { %v402_v55 = vsel %vm382_vm0, %v308_v27, %v1358_v47  ;;  %v622_v27 = vld [vmem:[#allocation11 + $0x30] sm:$0xff]  ;;  %v675_v47 = vld [vmem:[#allocation11 + $0x1d8] sm:$0xff]  ;;  %v1756_v49 = vpack.c.bf16 %v657_v43, %v656_v41  ;;  %v847_v41 = vld [vmem:[#allocation13 + $0x60] sm:$0xff] }
 0x19f   :  { %540 = vmatprep.mubr.f32.mxu0 %v402_v55  ;;  %v404_v60 = vsel %vm384_vm2, %v379_v30, %v1360_v51  ;;  %v1750_v30 = vpack.c.bf16 %v671_v23, %v670_v22  ;;  %v1720_v36 = vpack.c.bf16 %v623_v28, %v622_v27  ;;  %v626_v51 = vld [vmem:[#allocation11 + $0x50] sm:$0xff]  ;;  %v1758_v54 = vpack.c.bf16 %v675_v47, %v674_v46  ;;  %v663_v23 = vld [vmem:[#allocation11 + $0x178] sm:$0xff]  ;;  %v840_v27 = vld [vmem:[#allocation13 + $0x28] sm:$0xff] }
 0x1a0   :  { %610 = vmatprep.mubr.f32.mxu1 %v404_v60  ;;  %541 = vmatmul.mubr.f32.vlgmr.msra.gmra.mrb[2].mxu0 %v2439_v61  ;;  %v662_v22 = vld [vmem:[#allocation11 + $0x170] sm:$0xff]  ;;  %v838_v28 = vld [vmem:[#allocation13 + $0x18] sm:$0xff]  ;;  %v1776_v43 = vpack.c.bf16 %v847_v41, %v843_v40  ;;  %v1808_v46 = vpack.c.bf16 %v849_v45, %v845_v44  ;;  %v852_v47 = vld [vmem:[#allocation13 + $0x88] sm:$0xff] }
 0x1a1   :  { %611 = vmatmul.mubr.f32.vlgmr.msra.gmra.mrb[2].mxu1 %v2442_v3  ;;  %1709 = vmatpush3.bf16.msra.mxu0 %v1708_v52  ;;  %v627_v52 = vld [vmem:[#allocation11 + $0x58] sm:$0xff]  ;;  %v883_v41 = vld [vmem:[#allocation13 + $0x180] sm:$0xff]  ;;  %v885_v44 = vld [vmem:[#allocation13 + $0x190] sm:$0xff] }
 0x1a2   :  { %1741 = vmatpush3.bf16.msra.mxu1 %v1740_v56  ;;  %751 = vmatprep.mubr.f32.mxu0 %v402_v55  ;;  %v659_v55 = vld [vmem:[#allocation11 + $0x158] sm:$0xff]  ;;  %v644_v56 = vld [vmem:[#allocation11 + $0xe0] sm:$0xff]  ;;  %v889_v45 = vld [vmem:[#allocation13 + $0x1b0] sm:$0xff] }
 0x1a3   :  { %821 = vmatprep.mubr.f32.mxu1 %v404_v60  ;;  %1711 = vmatprep.subr.bf16.mxu0 %v1710_v62  ;;  %v1728_v60 = vpack.c.bf16 %v627_v52, %v626_v51  ;;  %v1760_v62 = vpack.c.bf16 %v659_v55, %v658_v53  ;;  %v1730_v63 = vpack.c.bf16 %v645_v57, %v644_v56  ;;  %v850_v39 = vld [vmem:[#allocation13 + $0x78] sm:$0xff]  ;;  %v851_v52 = vld [vmem:[#allocation13 + $0x80] sm:$0xff]  ;;  %v853_v56 = vld [vmem:[#allocation13 + $0x90] sm:$0xff] }
 0x1a4   :  { %1743 = vmatprep.subr.bf16.mxu1 %v1742_v4  ;;  %v660_v4 = vld [vmem:[#allocation11 + $0x160] sm:$0xff]  ;;  %v858_v51 = vld [vmem:[#allocation13 + $0xb8] sm:$0xff]  ;;  %v857_v57 = vld [vmem:[#allocation13 + $0xb0] sm:$0xff] }
 0x1a5   :  { %1713 = vmatpush3.bf16.msra.mxu0 %v1712_v7  ;;  %v646_v7 = vld [vmem:[#allocation11 + $0xf0] sm:$0xff]  ;;  %v1764_v14 = vpack.c.bf16 %v661_v6, %v660_v4  ;;  %v855_v53 = vld [vmem:[#allocation13 + $0xa0] sm:$0xff]  ;;  %v1812_v58 = vpack.c.bf16 %v857_v57, %v853_v56  ;;  %v890_v40 = vld [vmem:[#allocation13 + $0x1b8] sm:$0xff] }
 0x1a6   :  { %1745 = vmatpush3.bf16.msra.mxu1 %v1744_v8  ;;  %1715 = vmatprep.subr.bf16.mxu0 %v1714_v9  ;;  %v647_v8 = vld [vmem:[#allocation11 + $0xf8] sm:$0xff]  ;;  %v678_v9 = vld [vmem:[#allocation11 + $0x1f0] sm:$0xff]  ;;  %v1780_v55 = vpack.c.bf16 %v855_v53, %v851_v52  ;;  %v863_v4 = vld [vmem:[#allocation13 + $0xe0] sm:$0xff] }
 0x1a7   :  { %1747 = vmatprep.subr.bf16.mxu1 %v1746_v18  ;;  %v1734_v18 = vpack.c.bf16 %v647_v8, %v646_v7  ;;  %v1766_v21 = vpack.c.bf16 %v679_v10, %v678_v9  ;;  %v1784_v6 = vpack.c.bf16 %v863_v4, %v859_v2  ;;  %v861_v7 = vld [vmem:[#allocation13 + $0xd0] sm:$0xff]  ;;  %v868_v10 = vld [vmem:[#allocation13 + $0x108] sm:$0xff]  ;;  %v898_v52 = vld [vmem:[#allocation13 + $0x1f8] sm:$0xff] }
 0x1a8   :  { %v865_v8 = vld [vmem:[#allocation13 + $0xf0] sm:$0xff]  ;;  %v891_v53 = vld [vmem:[#allocation13 + $0x1c0] sm:$0xff]  ;;  %v1136_v2 = vld [vmem:[#allocation14 + $0x188] sm:$0xff] }
 0x1a9   :  { %1717 = vmatpush3.bf16.msra.mxu0 %v1716_v24  ;;  %v1736_v24 = vpack.c.bf16 %v631_v20, %v630_v19  ;;  %v1816_v9 = vpack.c.bf16 %v865_v8, %v861_v7  ;;  %v874_v19 = vld [vmem:[#allocation13 + $0x138] sm:$0xff]  ;;  %v867_v20 = vld [vmem:[#allocation13 + $0x100] sm:$0xff]  ;;  %v893_v56 = vld [vmem:[#allocation13 + $0x1d0] sm:$0xff] }
 0x1aa   :  { %1749 = vmatpush3.bf16.msra.mxu1 %v1748_v25  ;;  %1719 = vmatprep.subr.bf16.mxu0 %v1718_v26  ;;  %v1768_v25 = vpack.c.bf16 %v663_v23, %v662_v22  ;;  %v836_v26 = vld [vmem:[#allocation13 + $0x8] sm:$0xff]  ;;  %v897_v57 = vld [vmem:[#allocation13 + $0x1f0] sm:$0xff] }
 0x1ab   :  { %1751 = vmatprep.subr.bf16.mxu1 %v1750_v30  ;;  %v1770_v29 = vpack.c.bf16 %v840_v27, %v836_v26  ;;  %v842_v30 = vld [vmem:[#allocation13 + $0x38] sm:$0xff]  ;;  %v876_v26 = vld [vmem:[#allocation13 + $0x148] sm:$0xff] }
 0x1ac   :  { %v1802_v33 = vpack.c.bf16 %v842_v30, %v838_v28  ;;  %v880_v28 = vld [vmem:[#allocation13 + $0x168] sm:$0xff]  ;;  %v882_v30 = vld [vmem:[#allocation13 + $0x178] sm:$0xff] }
 0x1ad   :  { %1721 = vmatpush3.bf16.msra.mxu0 %v1720_v36  ;;  %v841_v36 = vld [vmem:[#allocation13 + $0x30] sm:$0xff]  ;;  %v1790_v31 = vpack.c.bf16 %v880_v28, %v876_v26  ;;  %v1361_v7 = vld [vmem:[%s2511_s6] ss:$0 sm:$0xff] }
 0x1ae   :  { %1753 = vmatpush3.bf16.msra.mxu1 %v1752_v37  ;;  %1723 = vmatprep.subr.bf16.mxu0 %v1722_v38  ;;  %v1804_v37 = vpack.c.bf16 %v841_v36, %v837_v35  ;;  %v846_v38 = vld [vmem:[#allocation13 + $0x58] sm:$0xff]  ;;  %v877_v35 = vld [vmem:[#allocation13 + $0x150] sm:$0xff] }
 0x1af   :  { %1755 = vmatprep.subr.bf16.mxu1 %v1754_v42  ;;  %v1806_v42 = vpack.c.bf16 %v850_v39, %v846_v38  ;;  %v886_v39 = vld [vmem:[#allocation13 + $0x198] sm:$0xff] }
 0x1b1   :  { %1725 = vmatpush3.bf16.msra.mxu0 %v1724_v48  ;;  %v856_v48 = vld [vmem:[#allocation13 + $0xa8] sm:$0xff] }
 0x1b2   :  { %1757 = vmatpush3.bf16.msra.mxu1 %v1756_v49  ;;  %1727 = vmatprep.subr.bf16.mxu0 %v1726_v50  ;;  %v854_v49 = vld [vmem:[#allocation13 + $0x98] sm:$0xff]  ;;  %v1778_v50 = vpack.c.bf16 %v856_v48, %v852_v47  ;;  %v892_v47 = vld [vmem:[#allocation13 + $0x1c8] sm:$0xff] }
 0x1b3   :  { %1759 = vmatprep.subr.bf16.mxu1 %v1758_v54  ;;  %v1810_v54 = vpack.c.bf16 %v858_v51, %v854_v49  ;;  %v896_v48 = vld [vmem:[#allocation13 + $0x1e8] sm:$0xff]  ;;  %v894_v49 = vld [vmem:[#allocation13 + $0x1d8] sm:$0xff] }
 0x1b4   :  { %v1798_v51 = vpack.c.bf16 %v896_v48, %v892_v47  ;;  %v1121_v47 = vld [vmem:[#allocation14 + $0x110] sm:$0xff]  ;;  %v1122_v48 = vld [vmem:[#allocation14 + $0x118] sm:$0xff] }
 0x1b5   :  { %1729 = vmatpush3.bf16.msra.mxu0 %v1728_v60  ;;  %v864_v60 = vld [vmem:[#allocation13 + $0xe8] sm:$0xff] }
 0x1b6   :  { %1761 = vmatpush3.bf16.msra.mxu1 %v1760_v62  ;;  %1731 = vmatprep.subr.bf16.mxu0 %v1730_v63  ;;  %v862_v62 = vld [vmem:[#allocation13 + $0xd8] sm:$0xff]  ;;  %v1782_v63 = vpack.c.bf16 %v864_v60, %v860_v59  ;;  %v1832_v59 = vpack.c.bf16 %v897_v57, %v893_v56  ;;  %v1103_v60 = vld [vmem:[#allocation14 + $0x80] sm:$0xff] }
 0x1b7   :  { %1763 = vmatprep.subr.bf16.mxu1 %v1762_v5  ;;  %v1814_v5 = vpack.c.bf16 %v866_v1, %v862_v62  ;;  %v1104_v62 = vld [vmem:[#allocation14 + $0x88] sm:$0xff]  ;;  %v1091_v57 = vld [vmem:[#allocation14 + $0x20] sm:$0xff] }
 0x1b8   :  { %v1834_v1 = vpack.c.bf16 %v1104_v62, %v1103_v60  ;;  %v1124_v62 = vld [vmem:[#allocation14 + $0x128] sm:$0xff] }
 0x1b9   :  { %1733 = vmatpush3.bf16.msra.mxu0 %v1732_v11  ;;  %v872_v11 = vld [vmem:[#allocation13 + $0x128] sm:$0xff] }
 0x1ba   :  { %1765 = vmatpush3.bf16.msra.mxu1 %v1764_v14  ;;  %1735 = vmatprep.subr.bf16.mxu0 %v1734_v18  ;;  %v870_v14 = vld [vmem:[#allocation13 + $0x118] sm:$0xff]  ;;  %v1786_v18 = vpack.c.bf16 %v872_v11, %v868_v10 }
 0x1bb   :  { %1767 = vmatprep.subr.bf16.mxu1 %v1766_v21  ;;  %v871_v21 = vld [vmem:[#allocation13 + $0x120] sm:$0xff]  ;;  %v1818_v22 = vpack.c.bf16 %v874_v19, %v870_v14 }
 0x1bc   :  { %v1788_v23 = vpack.c.bf16 %v871_v21, %v867_v20  ;;  %v1362_v21 = vld [vmem:[%s2513_s8] ss:$0 sm:$0xff] }
 0x1bd   :  { %1737 = vmatpush3.bf16.msra.mxu0 %v1736_v24  ;;  %v869_v24 = vld [vmem:[#allocation13 + $0x110] sm:$0xff] }
 0x1be   :  { %1769 = vmatpush3.bf16.msra.mxu1 %v1768_v25  ;;  %1771 = vmatprep.subr.bf16.mxu0 %v1770_v29  ;;  %v873_v25 = vld [vmem:[#allocation13 + $0x130] sm:$0xff]  ;;  %v878_v29 = vld [vmem:[#allocation13 + $0x158] sm:$0xff] }
 0x1bf   :  { %1803 = vmatprep.subr.bf16.mxu1 %v1802_v33  ;;  %v1820_v27 = vpack.c.bf16 %v873_v25, %v869_v24  ;;  %v1822_v32 = vpack.c.bf16 %v882_v30, %v878_v29  ;;  %v875_v33 = vld [vmem:[#allocation13 + $0x140] sm:$0xff]  ;;  %v827_v30 = vld [vmem:[#allocation7] sm:$0xff] }
 0x1c0   :  { %752 = vmatmul.mubr.f32.vlgmr.msra.gmra.mrb[4].mxu0 %v2439_v61  ;;  %v844_v61 = vld [vmem:[#allocation13 + $0x48] sm:$0xff] }
 0x1c1   :  { %822 = vmatmul.mubr.f32.vlgmr.msra.gmra.mrb[4].mxu1 %v2442_v3  ;;  %985 = vmatprep.mubr.f32.mxu0 %v2204_v0  ;;  %v848_v3 = vld [vmem:[#allocation13 + $0x68] sm:$0xff] }
 0x1c2   :  { %1056 = vmatprep.mubr.f32.mxu1 %v2204_v0  ;;  %1773 = vmatpush1.bf16.msra.mxu0 %v1772_v34  ;;  %v1774_v0 = vpack.c.bf16 %v848_v3, %v844_v61  ;;  %v879_v34 = vld [vmem:[#allocation13 + $0x160] sm:$0xff]  ;;  %v884_v61 = vld [vmem:[#allocation13 + $0x188] sm:$0xff] }
 0x1c3   :  { %1805 = vmatpush1.bf16.msra.mxu1 %v1804_v37  ;;  %v1792_v36 = vpack.c.bf16 %v879_v34, %v875_v33  ;;  %v881_v37 = vld [vmem:[#allocation13 + $0x170] sm:$0xff]  ;;  %v888_v3 = vld [vmem:[#allocation13 + $0x1a8] sm:$0xff]  ;;  %v1087_v33 = vld [vmem:[#allocation14] sm:$0xff] }
 0x1c4   :  { %1775 = vmatprep.subr.bf16.mxu0 %v1774_v0  ;;  %1807 = vmatprep.subr.bf16.mxu1 %v1806_v42  ;;  %v1824_v38 = vpack.c.bf16 %v881_v37, %v877_v35  ;;  %v1794_v0 = vpack.c.bf16 %v888_v3, %v884_v61  ;;  %v1826_v42 = vpack.c.bf16 %v890_v40, %v886_v39  ;;  %v1088_v34 = vld [vmem:[#allocation14 + $0x8] sm:$0xff]  ;;  %v1105_v61 = vld [vmem:[#allocation14 + $0x90] sm:$0xff]  ;;  %v1106_v3 = vld [vmem:[#allocation14 + $0x98] sm:$0xff] }
 0x1c5   :  { %v1120_v37 = vld [vmem:[#allocation14 + $0x108] sm:$0xff]  ;;  %v1836_v40 = vpack.c.bf16 %v1088_v34, %v1087_v33  ;;  %v1145_v33 = vld [vmem:[#allocation14 + $0x1d0] sm:$0xff] }
 0x1c6   :  { %1777 = vmatpush1.bf16.msra.mxu0 %v1776_v43  ;;  %v887_v43 = vld [vmem:[#allocation13 + $0x1a0] sm:$0xff] }
 0x1c7   :  { %1809 = vmatpush1.bf16.msra.mxu1 %v1808_v46  ;;  %1779 = vmatprep.subr.bf16.mxu0 %v1778_v50  ;;  %v1796_v46 = vpack.c.bf16 %v887_v43, %v883_v41  ;;  %v1828_v50 = vpack.c.bf16 %v889_v45, %v885_v44  ;;  %v1090_v43 = vld [vmem:[#allocation14 + $0x18] sm:$0xff]  ;;  %v1838_v45 = vpack.c.bf16 %v1106_v3, %v1105_v61 }
 0x1c8   :  { %1811 = vmatprep.subr.bf16.mxu1 %v1810_v54  ;;  %v895_v54 = vld [vmem:[#allocation13 + $0x1e0] sm:$0xff] }
 0x1ca   :  { %1781 = vmatpush1.bf16.msra.mxu0 %v1780_v55  ;;  %v1830_v55 = vpack.c.bf16 %v898_v52, %v894_v49  ;;  %v1107_v49 = vld [vmem:[#allocation14 + $0xa0] sm:$0xff]  ;;  %v1140_v52 = vld [vmem:[#allocation14 + $0x1a8] sm:$0xff] }
 0x1cb   :  { %1813 = vmatpush1.bf16.msra.mxu1 %v1812_v58  ;;  %1783 = vmatprep.subr.bf16.mxu0 %v1782_v63  ;;  %v1800_v58 = vpack.c.bf16 %v895_v54, %v891_v53  ;;  %v1135_v63 = vld [vmem:[#allocation14 + $0x180] sm:$0xff]  ;;  %v1872_v54 = vpack.c.bf16 %v1122_v48, %v1121_v47  ;;  %v1100_v47 = vld [vmem:[#allocation14 + $0x68] sm:$0xff] }
 0x1cc   :  { %1815 = vmatprep.subr.bf16.mxu1 %v1814_v5  ;;  %v1866_v4 = vpack.c.bf16 %v1136_v2, %v1135_v63  ;;  %v1110_v2 = vld [vmem:[#allocation14 + $0xb8] sm:$0xff]  ;;  %v1131_v48 = vld [vmem:[#allocation14 + $0x160] sm:$0xff] }
 0x1ce   :  { %1785 = vmatpush1.bf16.msra.mxu0 %v1784_v6 }
 0x1cf   :  { %1817 = vmatpush1.bf16.msra.mxu1 %v1816_v9  ;;  %1787 = vmatprep.subr.bf16.mxu0 %v1786_v18 }
 0x1d0   :  { %1819 = vmatprep.subr.bf16.mxu1 %v1818_v22 }
 0x1d2   :  { %1789 = vmatpush1.bf16.msra.mxu0 %v1788_v23 }
 0x1d3   :  { %1821 = vmatpush1.bf16.msra.mxu1 %v1820_v27  ;;  %1791 = vmatprep.subr.bf16.mxu0 %v1790_v31 }
 0x1d4   :  { %1823 = vmatprep.subr.bf16.mxu1 %v1822_v32  ;;  %v833_v32 = vld [vmem:[#allocation5] sm:$0xff] }
 0x1d6   :  { %1793 = vmatpush1.bf16.msra.mxu0 %v1792_v36  ;;  %v1119_v36 = vld [vmem:[#allocation14 + $0x100] sm:$0xff] }
 0x1d7   :  { %1825 = vmatpush1.bf16.msra.mxu1 %v1824_v38  ;;  %1795 = vmatprep.subr.bf16.mxu0 %v1794_v0  ;;  %v1137_v38 = vld [vmem:[#allocation14 + $0x190] sm:$0xff]  ;;  %v1138_v0 = vld [vmem:[#allocation14 + $0x198] sm:$0xff]  ;;  %v1868_v41 = vpack.c.bf16 %v1120_v37, %v1119_v36 }
 0x1d8   :  { %1827 = vmatprep.subr.bf16.mxu1 %v1826_v42  ;;  %v1089_v42 = vld [vmem:[#allocation14 + $0x10] sm:$0xff]  ;;  %v1098_v37 = vld [vmem:[#allocation14 + $0x58] sm:$0xff] }
 0x1d9   :  { %v1840_v53 = vpack.c.bf16 %v1090_v43, %v1089_v42  ;;  %v1097_v36 = vld [vmem:[#allocation14 + $0x50] sm:$0xff]  ;;  %v1147_v42 = vld [vmem:[#allocation14 + $0x1e0] sm:$0xff]  ;;  %v1148_v43 = vld [vmem:[#allocation14 + $0x1e8] sm:$0xff] }
 0x1da   :  { %1797 = vmatpush1.bf16.msra.mxu0 %v1796_v46  ;;  %v1870_v46 = vpack.c.bf16 %v1138_v0, %v1137_v38  ;;  %v1856_v3 = vpack.c.bf16 %v1098_v37, %v1097_v36  ;;  %v1129_v38 = vld [vmem:[#allocation14 + $0x150] sm:$0xff]  ;;  %v1130_v0 = vld [vmem:[#allocation14 + $0x158] sm:$0xff] }
 0x1db   :  { %1829 = vmatpush1.bf16.msra.mxu1 %v1828_v50  ;;  %1799 = vmatprep.subr.bf16.mxu0 %v1798_v51  ;;  %v1108_v50 = vld [vmem:[#allocation14 + $0xa8] sm:$0xff]  ;;  %v1139_v51 = vld [vmem:[#allocation14 + $0x1a0] sm:$0xff] }
 0x1dc   :  { %1831 = vmatprep.subr.bf16.mxu1 %v1830_v55  ;;  %v1842_v55 = vpack.c.bf16 %v1108_v50, %v1107_v49  ;;  %v1874_v56 = vpack.c.bf16 %v1140_v52, %v1139_v51  ;;  %v1132_v50 = vld [vmem:[#allocation14 + $0x168] sm:$0xff]  ;;  %v1117_v51 = vld [vmem:[#allocation14 + $0xf0] sm:$0xff]  ;;  %v1118_v52 = vld [vmem:[#allocation14 + $0xf8] sm:$0xff] }
 0x1de   :  { %1801 = vmatpush1.bf16.msra.mxu0 %v1800_v58  ;;  %v1092_v58 = vld [vmem:[#allocation14 + $0x28] sm:$0xff] }
 0x1df   :  { %1833 = vmatpush1.bf16.msra.mxu1 %v1832_v59  ;;  %1835 = vmatprep.subr.bf16.mxu0 %v1834_v1  ;;  %v1123_v59 = vld [vmem:[#allocation14 + $0x120] sm:$0xff]  ;;  %v1844_v60 = vpack.c.bf16 %v1092_v58, %v1091_v57  ;;  %v1109_v1 = vld [vmem:[#allocation14 + $0xb0] sm:$0xff] }
 0x1e0   :  { %1867 = vmatprep.subr.bf16.mxu1 %v1866_v4  ;;  %v1876_v63 = vpack.c.bf16 %v1124_v62, %v1123_v59  ;;  %v1141_v4 = vld [vmem:[#allocation14 + $0x1b0] sm:$0xff]  ;;  %v1102_v59 = vld [vmem:[#allocation14 + $0x78] sm:$0xff] }
 0x1e1   :  { %v1101_v57 = vld [vmem:[#allocation14 + $0x70] sm:$0xff]  ;;  %v1134_v62 = vld [vmem:[#allocation14 + $0x178] sm:$0xff] }
 0x273   :  { %v1400_v5 = vpop.f32.mrb[2].mxu0 }
 0x274   :  { %v1435_v6 = vpop.f32.mrb[2].mxu1  ;;  %v1401_v8 = vpop.f32.mrb[3].mxu0 }
 0x275   :  { %v1402_v9 = vadd.f32 %v1401_v8, %v1400_v5  ;;  %v1436_v10 = vpop.f32.mrb[3].mxu1  ;;  %v1846_v5 = vpack.c.bf16 %v1110_v2, %v1109_v1  ;;  %v1094_v8 = vld [vmem:[#allocation14 + $0x38] sm:$0xff]  ;;  %v899_v2 = vld [vmem:[%s2515_s10] sm:$0xf]  ;;  %s2205_s10 = smov [#allocation17]  }
 0x276   :  { %v1437_v11 = vadd.f32 %v1436_v10, %v1435_v6  ;;  %v1142_v6 = vld [vmem:[#allocation14 + $0x1b8] sm:$0xff]  ;;  %s1327_s17 = sshll.u32 %s2205_s10, 4  ;;  %s1328_s17 = int_to_ptr.vmem [resolvable:$true] %s1327_s17 }
 0x277   :  { %v543_v14 = vadd.f32 %v1402_v9, %v1361_v7  ;;  %v1093_v7 = vld [vmem:[#allocation14 + $0x30] sm:$0xff]  ;;  %v1878_v9 = vpack.c.bf16 %v1142_v6, %v1141_v4  ;;  %v904_v4 = vrot.slane %v899_v2, %v221_v13  ;;  %v908_v6 = vrot.slane %v899_v2, %v225_v16  ;;  %s2112_s29 = scalar_lea.vmem %s1328_s17, 128  ;;  %p2117_p9 = scmp.lt.s32.totalorder %s1328_s17, %s1328_s17 }
 0x278   :  { %v1848_v10 = vpack.c.bf16 %v1094_v8, %v1093_v7  ;;  %v916_v7 = vrot.slane %v899_v2, %v233_v17  ;;  %p2113_p8 = scmp.ne.s32.totalorder %s1328_s17, %s2112_s29  ;;  %p2118_p10 = scmp.lt.s32.totalorder %s2112_s29, %s2112_s29 }
 0x279   :  { %v613_v18 = vadd.f32 %v1437_v11, %v543_v14  ;;  %v1125_v11 = vld [vmem:[#allocation14 + $0x130] sm:$0xff]  ;;  %v1126_v14 = vld [vmem:[#allocation14 + $0x138] sm:$0xff] }
 0x27a   :  { %p2119_p11 = por %p2118_p10, %p2117_p9 }
 0x27b   :  { %1309 = vst [vmem:[#allocation17] sm:$0xff] %v613_v18 }
 0x27c   :  { %p2120_p12 = pnand %p2119_p11, %p2113_p8 }
 0x293   :  { %v1470_v19 = vpop.f32.mrb[4].mxu0 }
 0x294   :  { %v1505_v20 = vpop.f32.mrb[4].mxu1  ;;  %v1471_v22 = vpop.f32.mrb[5].mxu0 }
 0x295   :  { %v1472_v23 = vadd.f32 %v1471_v22, %v1470_v19  ;;  %v1506_v24 = vpop.f32.mrb[5].mxu1  ;;  %v1111_v19 = vld [vmem:[#allocation14 + $0xc0] sm:$0xff] }
 0x296   :  { %v1507_v25 = vadd.f32 %v1506_v24, %v1505_v20  ;;  %v1112_v20 = vld [vmem:[#allocation14 + $0xc8] sm:$0xff]  ;;  %v1095_v24 = vld [vmem:[#allocation14 + $0x40] sm:$0xff] }
 0x297   :  { %v754_v26 = vadd.f32 %v1472_v23, %v1362_v21  ;;  %v1143_v21 = vld [vmem:[#allocation14 + $0x1c0] sm:$0xff]  ;;  %v1850_v22 = vpack.c.bf16 %v1112_v20, %v1111_v19  ;;  %v1144_v23 = vld [vmem:[#allocation14 + $0x1c8] sm:$0xff] }
 0x299   :  { %v824_v27 = vadd.f32 %v1507_v25, %v754_v26  ;;  %v1096_v25 = vld [vmem:[#allocation14 + $0x48] sm:$0xff]  ;;  %v1882_v26 = vpack.c.bf16 %v1144_v23, %v1143_v21 }
 0x29b   :  { %v828_v28 = vmul.f32 0.5, %v824_v27  ;;  %1310 = vst [vmem:[#allocation19] sm:$0xff] %v824_v27  ;;  %v1852_v27 = vpack.c.bf16 %v1096_v25, %v1095_v24 }
 0x29d   :  { %v829_v29 = vmul.f32 1.442695, %v828_v28  ;;  %v1127_v28 = vld [vmem:[#allocation14 + $0x140] sm:$0xff] }
 0x29f   :  { %1922 = vpow2.f32 %v829_v29  ;;  %v1128_v29 = vld [vmem:[#allocation14 + $0x148] sm:$0xff] }
 0x2a9   :  { %v1923_v31 = vpop.eup %1922 }
 0x2aa   :  { %v831_v35 = vmul.f32 %v1923_v31, %v827_v30  ;;  %v1884_v30 = vpack.c.bf16 %v1128_v29, %v1127_v28  ;;  %v1113_v31 = vld [vmem:[#allocation14 + $0xd0] sm:$0xff] }
 0x2ac   :  { %v832_v39 = vadd.f32 %v831_v35, %v613_v18  ;;  %v1880_v18 = vpack.c.bf16 %v1126_v14, %v1125_v11  ;;  %v1146_v35 = vld [vmem:[#allocation14 + $0x1d8] sm:$0xff] }
 0x2ad   :  { %v1886_v61 = vpack.c.bf16 %v1146_v35, %v1145_v33 }
 0x2ae   :  { %v834_v44 = vadd.f32 %v833_v32, %v832_v39  ;;  %v1114_v32 = vld [vmem:[#allocation14 + $0xd8] sm:$0xff]  ;;  %v1115_v39 = vld [vmem:[#allocation14 + $0xe0] sm:$0xff] }
 0x2af   :  { %v1854_v34 = vpack.c.bf16 %v1114_v32, %v1113_v31 }
 0x2b0   :  { %986 = vmatmul.mubr.f32.vlgmr.msra.gmra.mrb[6].mxu0 %v834_v44  ;;  %1057 = vmatmul.mubr.f32.vlgmr.msra.gmra.mrb[6].mxu1 %v834_v44 }
 0x2b1   :  { %1837 = vmatpush3.bf16.msra.mxu0 %v1836_v40  ;;  %1869 = vmatpush3.bf16.msra.mxu1 %v1868_v41  ;;  %v1888_v40 = vpack.c.bf16 %v1130_v0, %v1129_v38  ;;  %v1116_v41 = vld [vmem:[#allocation14 + $0xe8] sm:$0xff] }
 0x2b2   :  { %1839 = vmatprep.subr.bf16.mxu0 %v1838_v45  ;;  %1871 = vmatprep.subr.bf16.mxu1 %v1870_v46  ;;  %v1858_v44 = vpack.c.bf16 %v1116_v41, %v1115_v39  ;;  %v1890_v45 = vpack.c.bf16 %v1148_v43, %v1147_v42  ;;  %v1099_v46 = vld [vmem:[#allocation14 + $0x60] sm:$0xff] }
 0x2b3   :  { %v1860_v49 = vpack.c.bf16 %v1100_v47, %v1099_v46 }
 0x2b5   :  { %1841 = vmatpush3.bf16.msra.mxu0 %v1840_v53  ;;  %1873 = vmatpush3.bf16.msra.mxu1 %v1872_v54  ;;  %v1892_v53 = vpack.c.bf16 %v1132_v50, %v1131_v48  ;;  %v1862_v54 = vpack.c.bf16 %v1118_v52, %v1117_v51 }
 0x2b6   :  { %1843 = vmatprep.subr.bf16.mxu0 %v1842_v55  ;;  %1875 = vmatprep.subr.bf16.mxu1 %v1874_v56  ;;  %v1149_v55 = vld [vmem:[#allocation14 + $0x1f0] sm:$0xff]  ;;  %v1150_v56 = vld [vmem:[#allocation14 + $0x1f8] sm:$0xff] }
 0x2b7   :  { %v1894_v58 = vpack.c.bf16 %v1150_v56, %v1149_v55 }
 0x2b9   :  { %1845 = vmatpush3.bf16.msra.mxu0 %v1844_v60  ;;  %1877 = vmatpush3.bf16.msra.mxu1 %v1876_v63  ;;  %v1133_v60 = vld [vmem:[#allocation14 + $0x170] sm:$0xff]  ;;  %v1864_v63 = vpack.c.bf16 %v1102_v59, %v1101_v57 }
 0x2ba   :  { %1847 = vmatprep.subr.bf16.mxu0 %v1846_v5  ;;  %1879 = vmatprep.subr.bf16.mxu1 %v1878_v9  ;;  %v1896_v1 = vpack.c.bf16 %v1134_v62, %v1133_v60  ;;  %v912_v5 = vrot.slane %v899_v2, %v229_v15 }
 0x2bd   :  { %1849 = vmatpush3.bf16.msra.mxu0 %v1848_v10  ;;  %1881 = vmatpush3.bf16.msra.mxu1 %v1880_v18 }
 0x2be   :  { %1851 = vmatprep.subr.bf16.mxu0 %v1850_v22  ;;  %1883 = vmatprep.subr.bf16.mxu1 %v1882_v26 }
 0x2c1   :  { %1853 = vmatpush3.bf16.msra.mxu0 %v1852_v27  ;;  %1885 = vmatpush3.bf16.msra.mxu1 %v1884_v30 }
 0x2c2   :  { %1855 = vmatprep.subr.bf16.mxu0 %v1854_v34  ;;  %1887 = vmatprep.subr.bf16.mxu1 %v1886_v61 }
 0x2c5   :  { %1857 = vmatpush3.bf16.msra.mxu0 %v1856_v3  ;;  %1889 = vmatpush3.bf16.msra.mxu1 %v1888_v40 }
 0x2c6   :  { %1859 = vmatprep.subr.bf16.mxu0 %v1858_v44  ;;  %1891 = vmatprep.subr.bf16.mxu1 %v1890_v45 }
 0x2c9   :  { %1861 = vmatpush3.bf16.msra.mxu0 %v1860_v49  ;;  %1893 = vmatpush3.bf16.msra.mxu1 %v1892_v53 }
 0x2ca   :  { %1863 = vmatprep.subr.bf16.mxu0 %v1862_v54  ;;  %1895 = vmatprep.subr.bf16.mxu1 %v1894_v58 }
 0x2cd   :  { %1865 = vmatpush3.bf16.msra.mxu0 %v1864_v63  ;;  %1897 = vmatpush3.bf16.msra.mxu1 %v1896_v1 }
 0x383   :  { %v987_v8 = vpop.f32.mrb[6].mxu0  ;;  %v1058_v9 = vpop.f32.mrb[6].mxu1 }
 0x384   :  { %v988_v10 = vadd.f32 %v987_v8, %v904_v4  ;;  %v1059_v11 = vadd.f32 %v1058_v9, %v912_v5  ;;  %v989_v14 = vpop.f32.mrb[7].mxu0  ;;  %v1060_v18 = vpop.f32.mrb[7].mxu1 }
 0x385   :  { %v990_v19 = vadd.f32 %v989_v14, %v908_v6  ;;  %v1061_v20 = vadd.f32 %v1060_v18, %v916_v7 }
 0x386   :  { %v1067_v21 = vmin.f32 %v988_v10, 0.0  ;;  %v1069_v22 = vmin.f32 %v1059_v11, 0.0  ;;  %vm1063_vm5 = vcmp.gt.f32.partialorder %v988_v10, 0.0  ;;  %vm1065_vm7 = vcmp.gt.f32.partialorder %v1059_v11, 0.0 }
 0x387   :  { %v1068_v13 = vmin.f32 %v990_v19, 0.0  ;;  %v1070_v23 = vmin.f32 %v1061_v20, 0.0  ;;  %vm1064_vm4 = vcmp.gt.f32.partialorder %v990_v19, 0.0  ;;  %vm1066_vm6 = vcmp.gt.f32.partialorder %v1061_v20, 0.0 }
 0x388   :  { %v1071_v24 = vmul.f32 1.442695, %v1067_v21  ;;  %v1075_v15 = vmul.f32 1.442695, %v1069_v22 }
 0x389   :  { %v1073_v25 = vmul.f32 1.442695, %v1068_v13  ;;  %v1077_v26 = vmul.f32 1.442695, %v1070_v23 }
 0x38a   :  { %1924 = vpow2.f32 %v1071_v24 }
 0x38b   :  { %1926 = vpow2.f32 %v1075_v15 }
 0x38c   :  { %1928 = vpow2.f32 %v1073_v25 }
 0x38d   :  { %1930 = vpow2.f32 %v1077_v26 }
 0x394   :  { %v1925_v12 = vpop.eup %1924 }
 0x395   :  { %v1927_v16 = vpop.eup %1926  ;;  %v1363_v27 = vadd.f32 -1.0, %v1925_v12 }
 0x396   :  { %v1929_v17 = vpop.eup %1928  ;;  %v1365_v30 = vadd.f32 -1.0, %v1927_v16 }
 0x397   :  { %v1931_v28 = vpop.eup %1930  ;;  %v1364_v29 = vadd.f32 -1.0, %v1929_v17  ;;  %v1083_v34 = vsel %vm1063_vm5, %v988_v10, %v1363_v27 }
 0x398   :  { %v1366_v31 = vadd.f32 -1.0, %v1931_v28  ;;  %v1085_v35 = vsel %vm1065_vm7, %v1059_v11, %v1365_v30 }
 0x399   :  { %v1084_v32 = vsel %vm1064_vm4, %v990_v19, %v1364_v29 }
 0x39a   :  { %1222 = vmatprep.mubr.f32.mxu0 %v1084_v32  ;;  %v1086_v33 = vsel %vm1066_vm6, %v1061_v20, %v1366_v31 }
 0x39b   :  { %1292 = vmatprep.mubr.f32.mxu1 %v1086_v33  ;;  %1223 = vmatmul.mubr.f32.vlgmr.msra.gmra.mrb[8].mxu0 %v1083_v34 }
 0x39c   :  { %1293 = vmatmul.mubr.f32.vlgmr.msra.gmra.mrb[8].mxu1 %v1085_v35 }
 0x39d   :  { %2123 = shalt.err (!%p2120_p12)
}
 0x39e   :  { %s2124_s22 = scalar_lea.hbm %s2519_s14, 128 }
 0x39f   :  { %p2125_p13 = scmp.ne.s32.totalorder %s2519_s14, %s2124_s22  ;;  %p2128_p0 = scmp.lt.u32.totalorder %s2124_s22, %s2519_s14 }
 0x3a1   :  { %p2130_p1 = pnand %p2128_p0, %p2125_p13 }
 0x3a3   :  { %2133 = shalt.err (!%p2130_p1)
}
 0x3a4   :  { %1330 = dma.vmem_to_hbm [thread:$0]  %s1328_s17, 128, %s2519_s14, [#allocation18]  }
 0x3a5   :  { %s2206_s25 = smov [#allocation19]  }
 0x3a6   :  { %s1337_s0 = sshll.u32 %s2206_s25, 4  ;;  %s1338_s0 = int_to_ptr.vmem [resolvable:$true] %s1337_s0 }
 0x3a7   :  { %s2134_s7 = scalar_lea.vmem %s1338_s0, 128  ;;  %p2139_p3 = scmp.lt.s32.totalorder %s1338_s0, %s1338_s0 }
 0x3a8   :  { %p2135_p2 = scmp.ne.s32.totalorder %s1338_s0, %s2134_s7  ;;  %p2140_p4 = scmp.lt.s32.totalorder %s2134_s7, %s2134_s7 }
 0x3aa   :  { %p2141_p5 = por %p2140_p4, %p2139_p3 }
 0x3ac   :  { %p2142_p6 = pnand %p2141_p5, %p2135_p2 }
 0x3ae   :  { %2145 = shalt.err (!%p2142_p6)
}
 0x3af   :  { %s2146_s9 = scalar_lea.hbm %s2520_s15, 128 }
 0x3b0   :  { %p2147_p7 = scmp.ne.s32.totalorder %s2520_s15, %s2146_s9  ;;  %p2150_p8 = scmp.lt.u32.totalorder %s2146_s9, %s2520_s15 }
 0x3b2   :  { %p2152_p9 = pnand %p2150_p8, %p2147_p7 }
 0x3b4   :  { %2155 = shalt.err (!%p2152_p9)
}
 0x3b5   :  { %1340 = dma.vmem_to_hbm [thread:$0]  %s1338_s0, 128, %s2520_s15, [#allocation18]   ;;  %v1367_v61 = vld [vmem:[%s2517_s12] ss:$0 sm:$0xff] }
 0x3b6   :  { %s2207_s15 = smov [#allocation16]  }
 0x3b7   :  { %s1317_s6 = sshll.u32 %s2207_s15, 4  ;;  %s1318_s6 = int_to_ptr.vmem [resolvable:$true] %s1317_s6 }
 0x3b8   :  { %s2156_s12 = scalar_lea.vmem %s1318_s6, 128  ;;  %p2161_p11 = scmp.lt.s32.totalorder %s1318_s6, %s1318_s6 }
 0x3b9   :  { %p2157_p10 = scmp.ne.s32.totalorder %s1318_s6, %s2156_s12  ;;  %p2162_p12 = scmp.lt.s32.totalorder %s2156_s12, %s2156_s12 }
 0x3bb   :  { %p2163_p13 = por %p2162_p12, %p2161_p11 }
 0x3bd   :  { %p2164_p0 = pnand %p2163_p13, %p2157_p10 }
 0x46e   :  { %v1540_v36 = vpop.f32.mrb[8].mxu0 }
 0x46f   :  { %v1575_v37 = vpop.f32.mrb[8].mxu1  ;;  %v1541_v3 = vpop.f32.mrb[9].mxu0 }
 0x470   :  { %v1542_v38 = vadd.f32 %v1541_v3, %v1540_v36  ;;  %v1576_v0 = vpop.f32.mrb[9].mxu1 }
 0x471   :  { %v1577_v39 = vadd.f32 %v1576_v0, %v1575_v37 }
 0x472   :  { %v1225_v40 = vadd.f32 %v1542_v38, %v1367_v61 }
 0x474   :  { %v1295_v41 = vadd.f32 %v1577_v39, %v1225_v40 }
 0x476   :  { %v1298_v42 = vand.u32 2147483647, %v1295_v41  ;;  %vm1302_vm8 = vcmp.ge.f32.partialorder %v1295_v41, 0.0 }
 0x478   :  { %v1299_v43 = vsub.f32 0.0, %v1298_v42 }
 0x47a   :  { %v1300_v44 = vmul.f32 1.442695, %v1299_v43 }
 0x47c   :  { %1932 = vpow2.f32 %v1300_v44 }
 0x486   :  { %v1933_v45 = vpop.eup %1932 }
 0x487   :  { %v1303_v46 = vadd.f32 1.0, %v1933_v45 }
 0x489   :  { %1934 = vrcp.f32 %v1303_v46 }
 0x493   :  { %v1935_v47 = vpop.eup %1934 }
 0x494   :  { %v1306_v48 = vmul.f32 %v1935_v47, %v1933_v45 }
 0x496   :  { %v1307_v49 = vsel %vm1302_vm8, %v1935_v47, %v1306_v48 }
 0x497   :  { %1308 = vst [vmem:[#allocation16] sm:$0xff] %v1307_v49 }
 0x498   :  { %2167 = shalt.err (!%p2164_p0)
}
 0x499   :  { %s2168_s17 = scalar_lea.hbm %s2518_s13, 128 }
 0x49a   :  { %p2169_p1 = scmp.ne.s32.totalorder %s2518_s13, %s2168_s17  ;;  %p2172_p2 = scmp.lt.u32.totalorder %s2168_s17, %s2518_s13 }
 0x49c   :  { %p2174_p3 = pnand %p2172_p2, %p2169_p1 }
 0x49e   :  { %2177 = shalt.err (!%p2174_p3)
}
 0x49f   :  { %1320 = dma.vmem_to_hbm [thread:$0]  %s1318_s6, 128, %s2518_s13, [#allocation4]  }
 0x4a0   :  { %2188 = dma.done.wait [#allocation4], 128  }
 0x4a1   :  { %2189 = vsyncadd [#allocation4], 4294967168 }
 0x4a2   :  { %2190 = dma.done.wait [#allocation18], 256  }
 0x4a3   :  { %2191 = vsyncadd [#allocation18], 4294967040 }
 0x4a4   :  { %1350 = vsyncpa [#allocation3], 1 }
 0x4a5   :  { %1351 = vsyncpa [#allocation6], 1 }
 0x4a6   :  { %1352 = vsyncpa [#allocation9], 1 }
 0x4a7   :  { %1353 = vsyncpa [#allocation12], 1 }
 0x4a8   :  { %1354 = vsyncpa [#allocation15], 1 }
 0x4a9   :  { %1355 = vsyncpa [#allocation4], 1 }
 0x4aa   :  { %1356 = vsyncpa [#allocation18], 1 }

</bundles_post_ra>
